<compile_context>
chip_gen: v7x
topology: tpu7x:2x2x1
jax: 0.10.0
libtpu: 0.0.40
codegen_flags: <defaults>
</compile_context>

<pallas_src>
import jax
import jax.numpy as jnp
import numpy as np
from jax.experimental import pallas as pl
from jax.experimental.pallas import tpu as pltpu

_VMEM_LIMIT = 48 * 1024 * 1024   # fits v7x's 64 MiB physical VMEM with headroom


def _choose_nb(n):
    """Batch tile: large enough to amortize the ~0.35us/step overhead and fill
    the MXU, >=2 grid steps once the batch allows it (v7x dual TC), multiple of
    16 (bf16 sublane tile) so every block / reshape is layout-friendly."""
    steps = max(2 if n >= 32 else 1, pl.cdiv(n, 256))
    return pl.cdiv(n, steps * 16) * 16


# ----------------------------- fused kernel --------------------------------

def _cnn1_kernel(xw_ref, a1_ref, b1_ref, a2_ref, b2_ref,
                 w1_ref, fb1_ref, w2_ref, fb2_ref, o_ref):
    """Whole CNN_1 forward for one batch tile.

    xw_ref : (4, 6, nb, 140) bf16  windowed input, [off, q, n, ki*28 + w]
    a1_ref : (140, 256)      bf16  conv1 lowered weights, cols = (dw, wp, cout) pad 128
    b1_ref : (1, 128)        f32   conv1 bias tiled over pooled width
    a2_ref : (5, 128, 256)   bf16  conv2 lowered weights per kernel row ki
    b2_ref : (1, 128)        f32   conv2 bias tiled over pooled width
    w1_ref : (4, 128, 64)    bf16  fc1 weights per pooled row hp2 (flatten-free)
    fb1_ref: (1, 64)         f32
    w2_ref : (64, 10)        bf16
    fb2_ref: (1, 10)         f32
    o_ref  : (nb, 10)        f32   log-probs
    """
    nb = o_ref.shape[0]
    f32 = jnp.float32
    bf16 = jnp.bfloat16

    # ---- conv1 (5x5, cin=1) + 2x2 max-pool + bias + ReLU -------------------
    # conv row h = 4*q + off with off = 2*p + dh; pooled row hp = 2*q + p, so
    # the H-pool is an element-wise max over the two dh matmul results.
    a1 = a1_ref[...]
    b1 = b1_ref[...]
    h1 = []
    for p in range(2):
        acc = None
        for dh in range(2):
            lhs = xw_ref[2 * p + dh].reshape(6 * nb, 140)           # rows (q, n)
            g = jnp.dot(lhs, a1, preferred_element_type=f32)        # (6*nb, 256)
            acc = g if acc is None else jnp.maximum(acc, g)         # H-pool
        m = jnp.maximum(acc[:, :128], acc[:, 128:])                 # W-pool (dw)
        m = jnp.maximum(m + b1, 0.0)                                # bias + ReLU
        h1.append(m.astype(bf16).reshape(6, nb, 128))               # rows hp = 2q+p

    # ---- conv2 (5x5, cin=10) + 2x2 max-pool + bias + ReLU ------------------
    # TODO(synk): Dropout2d on the conv2 output is identity (eval semantics).
    b2 = b2_ref[...]
    acc = None
    for dh in range(2):
        g = jnp.zeros((4 * nb, 256), f32)
        for ki in range(5):
            t = dh + ki                                             # h1 row = 2*hp2 + t
            lhs = h1[t % 2][t // 2:t // 2 + 4].reshape(4 * nb, 128)  # rows (hp2, n)
            g = g + jnp.dot(lhs, a2_ref[ki], preferred_element_type=f32)
        acc = g if acc is None else jnp.maximum(acc, g)             # H-pool
    m = jnp.maximum(acc[:, :128], acc[:, 128:])                     # W-pool
    h2 = jnp.maximum(m + b2, 0.0)                                   # (4*nb, 128)

    # ---- fc1 + ReLU + fc2 + log_softmax ------------------------------------
    # TODO(synk): F.dropout after fc1 is identity (eval semantics).
    h2r = h2.astype(bf16).reshape(4, nb, 128)
    hid = jnp.zeros((nb, 64), f32)
    for hp2 in range(4):                                            # flatten-free fc1
        hid = hid + jnp.dot(h2r[hp2], w1_ref[hp2], preferred_element_type=f32)
    hid = jnp.maximum(hid + fb1_ref[...], 0.0).astype(bf16)
    logits = jnp.dot(hid, w2_ref[...], preferred_element_type=f32) + fb2_ref[...]
    mx = jnp.max(logits, axis=-1, keepdims=True)
    s = logits - mx
    lse = jnp.log(jnp.sum(jnp.exp(s), axis=-1, keepdims=True))
    o_ref[...] = s - lse


# ------------------------- parameter init / prep ---------------------------

def init_params(key):
    """PyTorch-style uniform(-1/sqrt(fan_in), 1/sqrt(fan_in)) init, torch layouts."""
    def uni(k, shape, fan_in):
        bound = 1.0 / jnp.sqrt(jnp.float32(fan_in))
        return jax.random.uniform(k, shape, jnp.float32, -bound, bound)

    ks = jax.random.split(key, 8)
    return {
        "conv1_w": uni(ks[0], (10, 1, 5, 5), 1 * 5 * 5),
        "conv1_b": uni(ks[1], (10,), 1 * 5 * 5),
        "conv2_w": uni(ks[2], (20, 10, 5, 5), 10 * 5 * 5),
        "conv2_b": uni(ks[3], (20,), 10 * 5 * 5),
        # fc weights stored transposed (in, out); fc1 rows in torch (c,h,w) order
        "fc1_w": uni(ks[4], (320, 50), 320),
        "fc1_b": uni(ks[5], (50,), 320),
        "fc2_w": uni(ks[6], (50, 10), 50),
        "fc2_b": uni(ks[7], (10,), 50),
    }


def _lowered_conv_mat(w, in_w, in_lanes, half_pad):
    """Width-lowered conv weights.

    Returns A of shape (kh, in_lanes, 2*half_pad) with
      A[ki, w_in*ci_n + ci, dw*half_pad + wp*co_n + co] = w[co, ci, ki, kj]
    where w_in = 2*wp + dw + kj, so that a matmul against activations whose
    lanes are (w_in, ci) produces columns ordered (dw, wp, co): the W-direction
    2x2 pool is then a max over the two dense half_pad lane halves.
    """
    co_n, ci_n, kh, kw = w.shape
    pw = (in_w - kw + 1) // 2
    a = np.zeros((kh, in_lanes, 2 * half_pad), np.float32)
    for ki in range(kh):
        for kj in range(kw):
            for dw in range(2):
                for wp in range(pw):
                    w_in = 2 * wp + dw + kj
                    col = dw * half_pad + wp * co_n
                    for ci in range(ci_n):
                        a[ki, w_in * ci_n + ci, col:col + co_n] = w[:, ci, ki, kj]
    return a


def prepare_params(params):
    """One-time host-side lowering of the torch-layout parameters (lane-padded)."""
    w1c = np.asarray(params["conv1_w"], np.float32)
    w2c = np.asarray(params["conv2_w"], np.float32)
    a1 = _lowered_conv_mat(w1c, in_w=28, in_lanes=28, half_pad=128).reshape(140, 256)
    a2 = _lowered_conv_mat(w2c, in_w=12, in_lanes=128, half_pad=128)   # (5,128,256)

    b1w = np.zeros((1, 128), np.float32)
    b1w[0, :120] = np.tile(np.asarray(params["conv1_b"], np.float32), 12)
    b2w = np.zeros((1, 128), np.float32)
    b2w[0, :80] = np.tile(np.asarray(params["conv2_b"], np.float32), 4)

    # fc1 rows re-ordered from torch (c,h,w)-flatten to the kernel's
    # (h, w*20+c) layout, split per pooled row h and lane-padded 80 -> 128.
    fc1 = np.asarray(params["fc1_w"], np.float32)            # (320, 50)
    w1p = np.zeros((4, 128, 64), np.float32)
    for h in range(4):
        for w in range(4):
            for c in range(20):
                w1p[h, w * 20 + c, :50] = fc1[c * 16 + h * 4 + w, :]
    fb1 = np.zeros((1, 64), np.float32)
    fb1[0, :50] = np.asarray(params["fc1_b"], np.float32)
    w2p = np.zeros((64, 10), np.float32)
    w2p[:50, :] = np.asarray(params["fc2_w"], np.float32)
    fb2 = np.asarray(params["fc2_b"], np.float32).reshape(1, 10)

    return {
        "a1": jnp.asarray(a1, jnp.bfloat16),
        "a2": jnp.asarray(a2, jnp.bfloat16),
        "b1": jnp.asarray(b1w, jnp.float32),
        "b2": jnp.asarray(b2w, jnp.float32),
        "w1": jnp.asarray(w1p, jnp.bfloat16),
        "fb1": jnp.asarray(fb1, jnp.float32),
        "w2": jnp.asarray(w2p, jnp.bfloat16),
        "fb2": jnp.asarray(fb2, jnp.float32),
    }


# --------------------------------- forward ---------------------------------

def _window_input(x):
    """(N, 28, 28) bf16 -> (4, 6, N, 140): out[off, q, n, ki*28 + w] = x[n, 4q+off+ki, w].

    The 4 'off' phases are the 2x2-pool phases (off = 2*p + dh, conv row
    h = 4*q + off, pooled row hp = 2*q + p), so both pool directions become
    plain element-wise maxes inside the kernel.  Built once by XLA; only
    6.7 KB/sample, kept in bf16.
    """
    n = x.shape[0]
    offs = []
    for off in range(4):
        qrows = []
        for q in range(6):
            r0 = 4 * q + off
            qrows.append(x[:, r0:r0 + 5, :].reshape(n, 140))
        offs.append(jnp.stack(qrows, axis=0))           # (6, N, 140)
    return jnp.stack(offs, axis=0)                       # (4, 6, N, 140)


def cnn1_forward(x_nchw, prep):
    n = x_nchw.shape[0]
    nb = _choose_nb(n)
    n_pad = pl.cdiv(n, nb) * nb
    x = x_nchw.reshape(n, 28, 28).astype(jnp.bfloat16)    # bf16 halves the HBM read
    if n_pad != n:
        x = jnp.pad(x, ((0, n_pad - n), (0, 0), (0, 0)))
    xw = _window_input(x)                                 # (4, 6, n_pad, 140)

    flops = int(n_pad) * (2 * 6 * 140 * 256 * 4 + 2 * 4 * 128 * 256 * 10
                          + 2 * 128 * 64 * 4 + 2 * 64 * 10)
    bytes_accessed = int(n_pad) * (4 * 6 * 140 * 2 + 10 * 4) + 500_000

    out = pl.pallas_call(
        _cnn1_kernel,
        out_shape=jax.ShapeDtypeStruct((n_pad, 10), jnp.float32),
        grid=(n_pad // nb,),
        in_specs=[
            pl.BlockSpec((4, 6, nb, 140), lambda i: (0, 0, i, 0)),   # windowed input
            pl.BlockSpec((140, 256), lambda i: (0, 0)),              # A1
            pl.BlockSpec((1, 128), lambda i: (0, 0)),                # conv1 bias
            pl.BlockSpec((5, 128, 256), lambda i: (0, 0, 0)),        # A2
            pl.BlockSpec((1, 128), lambda i: (0, 0)),                # conv2 bias
            pl.BlockSpec((4, 128, 64), lambda i: (0, 0, 0)),         # fc1 W
            pl.BlockSpec((1, 64), lambda i: (0, 0)),                 # fc1 b
            pl.BlockSpec((64, 10), lambda i: (0, 0)),                # fc2 W
            pl.BlockSpec((1, 10), lambda i: (0, 0)),                 # fc2 b
        ],
        out_specs=pl.BlockSpec((nb, 10), lambda i: (i, 0)),
        compiler_params=pltpu.CompilerParams(
            dimension_semantics=("parallel",),
            vmem_limit_bytes=_VMEM_LIMIT),
        cost_estimate=pl.CostEstimate(flops=flops, transcendentals=11 * int(n_pad),
                                      bytes_accessed=bytes_accessed),
    )(xw, prep["a1"], prep["b1"], prep["a2"], prep["b2"],
      prep["w1"], prep["fb1"], prep["w2"], prep["fb2"])
    return out[:n]                                        # drop batch padding


# --------------------------- plain-XLA reference ----------------------------

def _reference_forward(x_nchw, params):
    x = x_nchw.astype(jnp.float32)
    dn = ("NCHW", "OIHW", "NCHW")
    c1 = jax.lax.conv_general_dilated(x, params["conv1_w"], (1, 1), "VALID",
                                      dimension_numbers=dn)
    c1 = c1 + params["conv1_b"][None, :, None, None]
    p1 = jax.nn.relu(jax.lax.reduce_window(c1, -jnp.inf, jax.lax.max,
                                           (1, 1, 2, 2), (1, 1, 2, 2), "VALID"))
    c2 = jax.lax.conv_general_dilated(p1, params["conv2_w"], (1, 1), "VALID",
                                      dimension_numbers=dn)
    c2 = c2 + params["conv2_b"][None, :, None, None]
    p2 = jax.nn.relu(jax.lax.reduce_window(c2, -jnp.inf, jax.lax.max,
                                           (1, 1, 2, 2), (1, 1, 2, 2), "VALID"))
    flat = p2.reshape(x.shape[0], 320)
    h = jax.nn.relu(flat @ params["fc1_w"] + params["fc1_b"])
    logits = h @ params["fc2_w"] + params["fc2_b"]
    return jax.nn.log_softmax(logits, axis=-1)


if __name__ == "__main__":
    key = jax.random.PRNGKey(0)
    k_param, k_x = jax.random.split(key)
    params = init_params(k_param)
    prep = prepare_params(params)
    # MNIST-shaped input is required by the architecture (fc1 expects 320 = 20*4*4).
    x = jax.random.normal(k_x, (2, 1, 28, 28), dtype=jnp.float32)

    fwd = jax.jit(cnn1_forward)
    out = jax.block_until_ready(fwd(x, prep))

    assert out.shape == (2, 10)
    # log_softmax rows must sum to ~1 after exp
    row_sums = jnp.exp(out).sum(axis=-1)
    assert bool(jnp.all(jnp.abs(row_sums - 1.0) < 1e-3))

    # numerical sanity vs plain-XLA reference (bf16 MXU operands -> loose tol)
    ref = jax.jit(_reference_forward)(x, params)
    assert bool(jnp.max(jnp.abs(out - ref)) < 6e-2), "mismatch vs XLA reference"

    print("KERNEL_OK")
</pallas_src>

<mosaic_0001>
module attributes {stable_mosaic.version = 11 : i64} {
  func.func @_cnn1_kernel(%arg0: i32, %arg1: memref<4x6x16x140xbf16, #tpu.memory_space<vmem>>, %arg2: memref<140x256xbf16, #tpu.memory_space<vmem>>, %arg3: memref<1x128xf32, #tpu.memory_space<vmem>>, %arg4: memref<5x128x256xbf16, #tpu.memory_space<vmem>>, %arg5: memref<1x128xf32, #tpu.memory_space<vmem>>, %arg6: memref<4x128x64xbf16, #tpu.memory_space<vmem>>, %arg7: memref<1x64xf32, #tpu.memory_space<vmem>>, %arg8: memref<64x10xbf16, #tpu.memory_space<vmem>>, %arg9: memref<1x10xf32, #tpu.memory_space<vmem>>, %arg10: memref<16x10xf32, #tpu.memory_space<vmem>>) attributes {dimension_semantics = [#tpu.dimension_semantics<parallel>], iteration_bounds = array<i64: 1>, scalar_prefetch = 0 : i64, scratch_operands = 0 : i64, tpu.core_type = #tpu.core_type<tc>, window_params = [{transform_indices = @transform_0, window_bounds = array<i64: 4, 6, 16, 140>}, {pipeline_mode = #tpu.pipeline_mode<synchronous>, transform_indices = @transform_1, window_bounds = array<i64: 140, 256>}, {pipeline_mode = #tpu.pipeline_mode<synchronous>, transform_indices = @transform_2, window_bounds = array<i64: 1, 128>}, {pipeline_mode = #tpu.pipeline_mode<synchronous>, transform_indices = @transform_3, window_bounds = array<i64: 5, 128, 256>}, {pipeline_mode = #tpu.pipeline_mode<synchronous>, transform_indices = @transform_4, window_bounds = array<i64: 1, 128>}, {pipeline_mode = #tpu.pipeline_mode<synchronous>, transform_indices = @transform_5, window_bounds = array<i64: 4, 128, 64>}, {pipeline_mode = #tpu.pipeline_mode<synchronous>, transform_indices = @transform_6, window_bounds = array<i64: 1, 64>}, {pipeline_mode = #tpu.pipeline_mode<synchronous>, transform_indices = @transform_7, window_bounds = array<i64: 64, 10>}, {pipeline_mode = #tpu.pipeline_mode<synchronous>, transform_indices = @transform_8, window_bounds = array<i64: 1, 10>}, {transform_indices = @transform_9, window_bounds = array<i64: 16, 10>}]} {
    %c0 = arith.constant 0 : index
    %c0_0 = arith.constant 0 : index
    %0 = vector.load %arg2[%c0, %c0_0] : memref<140x256xbf16, #tpu.memory_space<vmem>>, vector<140x256xbf16>
    %c0_1 = arith.constant 0 : index
    %c0_2 = arith.constant 0 : index
    %1 = vector.load %arg3[%c0_1, %c0_2] : memref<1x128xf32, #tpu.memory_space<vmem>>, vector<1x128xf32>
    %c0_3 = arith.constant 0 : index
    %c0_4 = arith.constant 0 : index
    %c0_5 = arith.constant 0 : index
    %c0_6 = arith.constant 0 : index
    %2 = vector.load %arg1[%c0_3, %c0_4, %c0_5, %c0_6] : memref<4x6x16x140xbf16, #tpu.memory_space<vmem>>, vector<1x6x16x140xbf16>
    %3 = vector.shape_cast %2 : vector<1x6x16x140xbf16> to vector<6x16x140xbf16>
    %4 = vector.shape_cast %3 : vector<6x16x140xbf16> to vector<96x140xbf16>
    %cst = arith.constant dense<0.000000e+00> : vector<96x256xf32>
    %5 = tpu.matmul %4, %0, %cst {dimension_numbers = #tpu.dot_dimension_numbers<[1], [0], [0], [1], [0, 0, 1, 1], [], []>} : vector<96x140xbf16>, vector<140x256xbf16>, vector<96x256xf32> -> vector<96x256xf32>
    %c1 = arith.constant 1 : index
    %c0_7 = arith.constant 0 : index
    %c0_8 = arith.constant 0 : index
    %c0_9 = arith.constant 0 : index
    %6 = vector.load %arg1[%c1, %c0_7, %c0_8, %c0_9] : memref<4x6x16x140xbf16, #tpu.memory_space<vmem>>, vector<1x6x16x140xbf16>
    %7 = vector.shape_cast %6 : vector<1x6x16x140xbf16> to vector<6x16x140xbf16>
    %8 = vector.shape_cast %7 : vector<6x16x140xbf16> to vector<96x140xbf16>
    %cst_10 = arith.constant dense<0.000000e+00> : vector<96x256xf32>
    %9 = tpu.matmul %8, %0, %cst_10 {dimension_numbers = #tpu.dot_dimension_numbers<[1], [0], [0], [1], [0, 0, 1, 1], [], []>} : vector<96x140xbf16>, vector<140x256xbf16>, vector<96x256xf32> -> vector<96x256xf32>
    %10 = arith.maximumf %5, %9 : vector<96x256xf32>
    %11 = vector.extract_strided_slice %10 {offsets = [0, 0], sizes = [96, 128], strides = [1, 1]} : vector<96x256xf32> to vector<96x128xf32>
    %12 = vector.extract_strided_slice %10 {offsets = [0, 128], sizes = [96, 128], strides = [1, 1]} : vector<96x256xf32> to vector<96x128xf32>
    %13 = arith.maximumf %11, %12 : vector<96x128xf32>
    %14 = vector.broadcast %1 : vector<1x128xf32> to vector<96x128xf32>
    %15 = arith.addf %13, %14 : vector<96x128xf32>
    %cst_11 = arith.constant 0.000000e+00 : f32
    %16 = vector.broadcast %cst_11 : f32 to vector<96x128xf32>
    %17 = arith.maximumf %15, %16 : vector<96x128xf32>
    %18 = arith.truncf %17 : vector<96x128xf32> to vector<96x128xbf16>
    %19 = vector.shape_cast %18 : vector<96x128xbf16> to vector<6x16x128xbf16>
    %c2 = arith.constant 2 : index
    %c0_12 = arith.constant 0 : index
    %c0_13 = arith.constant 0 : index
    %c0_14 = arith.constant 0 : index
    %20 = vector.load %arg1[%c2, %c0_12, %c0_13, %c0_14] : memref<4x6x16x140xbf16, #tpu.memory_space<vmem>>, vector<1x6x16x140xbf16>
    %21 = vector.shape_cast %20 : vector<1x6x16x140xbf16> to vector<6x16x140xbf16>
    %22 = vector.shape_cast %21 : vector<6x16x140xbf16> to vector<96x140xbf16>
    %cst_15 = arith.constant dense<0.000000e+00> : vector<96x256xf32>
    %23 = tpu.matmul %22, %0, %cst_15 {dimension_numbers = #tpu.dot_dimension_numbers<[1], [0], [0], [1], [0, 0, 1, 1], [], []>} : vector<96x140xbf16>, vector<140x256xbf16>, vector<96x256xf32> -> vector<96x256xf32>
    %c3 = arith.constant 3 : index
    %c0_16 = arith.constant 0 : index
    %c0_17 = arith.constant 0 : index
    %c0_18 = arith.constant 0 : index
    %24 = vector.load %arg1[%c3, %c0_16, %c0_17, %c0_18] : memref<4x6x16x140xbf16, #tpu.memory_space<vmem>>, vector<1x6x16x140xbf16>
    %25 = vector.shape_cast %24 : vector<1x6x16x140xbf16> to vector<6x16x140xbf16>
    %26 = vector.shape_cast %25 : vector<6x16x140xbf16> to vector<96x140xbf16>
    %cst_19 = arith.constant dense<0.000000e+00> : vector<96x256xf32>
    %27 = tpu.matmul %26, %0, %cst_19 {dimension_numbers = #tpu.dot_dimension_numbers<[1], [0], [0], [1], [0, 0, 1, 1], [], []>} : vector<96x140xbf16>, vector<140x256xbf16>, vector<96x256xf32> -> vector<96x256xf32>
    %28 = arith.maximumf %23, %27 : vector<96x256xf32>
    %29 = vector.extract_strided_slice %28 {offsets = [0, 0], sizes = [96, 128], strides = [1, 1]} : vector<96x256xf32> to vector<96x128xf32>
    %30 = vector.extract_strided_slice %28 {offsets = [0, 128], sizes = [96, 128], strides = [1, 1]} : vector<96x256xf32> to vector<96x128xf32>
    %31 = arith.maximumf %29, %30 : vector<96x128xf32>
    %32 = vector.broadcast %1 : vector<1x128xf32> to vector<96x128xf32>
    %33 = arith.addf %31, %32 : vector<96x128xf32>
    %cst_20 = arith.constant 0.000000e+00 : f32
    %34 = vector.broadcast %cst_20 : f32 to vector<96x128xf32>
    %35 = arith.maximumf %33, %34 : vector<96x128xf32>
    %36 = arith.truncf %35 : vector<96x128xf32> to vector<96x128xbf16>
    %37 = vector.shape_cast %36 : vector<96x128xbf16> to vector<6x16x128xbf16>
    %c0_21 = arith.constant 0 : index
    %c0_22 = arith.constant 0 : index
    %38 = vector.load %arg5[%c0_21, %c0_22] : memref<1x128xf32, #tpu.memory_space<vmem>>, vector<1x128xf32>
    %cst_23 = arith.constant 0.000000e+00 : f32
    %39 = vector.broadcast %cst_23 : f32 to vector<64x256xf32>
    %40 = vector.extract_strided_slice %19 {offsets = [0, 0, 0], sizes = [4, 16, 128], strides = [1, 1, 1]} : vector<6x16x128xbf16> to vector<4x16x128xbf16>
    %41 = vector.shape_cast %40 : vector<4x16x128xbf16> to vector<64x128xbf16>
    %c0_24 = arith.constant 0 : index
    %c0_25 = arith.constant 0 : index
    %c0_26 = arith.constant 0 : index
    %42 = vector.load %arg4[%c0_24, %c0_25, %c0_26] : memref<5x128x256xbf16, #tpu.memory_space<vmem>>, vector<1x128x256xbf16>
    %43 = vector.shape_cast %42 : vector<1x128x256xbf16> to vector<128x256xbf16>
    %cst_27 = arith.constant dense<0.000000e+00> : vector<64x256xf32>
    %44 = tpu.matmul %41, %43, %cst_27 {dimension_numbers = #tpu.dot_dimension_numbers<[1], [0], [0], [1], [0, 0, 1, 1], [], []>} : vector<64x128xbf16>, vector<128x256xbf16>, vector<64x256xf32> -> vector<64x256xf32>
    %45 = arith.addf %39, %44 : vector<64x256xf32>
    %46 = vector.extract_strided_slice %37 {offsets = [0, 0, 0], sizes = [4, 16, 128], strides = [1, 1, 1]} : vector<6x16x128xbf16> to vector<4x16x128xbf16>
    %47 = vector.shape_cast %46 : vector<4x16x128xbf16> to vector<64x128xbf16>
    %c1_28 = arith.constant 1 : index
    %c0_29 = arith.constant 0 : index
    %c0_30 = arith.constant 0 : index
    %48 = vector.load %arg4[%c1_28, %c0_29, %c0_30] : memref<5x128x256xbf16, #tpu.memory_space<vmem>>, vector<1x128x256xbf16>
    %49 = vector.shape_cast %48 : vector<1x128x256xbf16> to vector<128x256xbf16>
    %cst_31 = arith.constant dense<0.000000e+00> : vector<64x256xf32>
    %50 = tpu.matmul %47, %49, %cst_31 {dimension_numbers = #tpu.dot_dimension_numbers<[1], [0], [0], [1], [0, 0, 1, 1], [], []>} : vector<64x128xbf16>, vector<128x256xbf16>, vector<64x256xf32> -> vector<64x256xf32>
    %51 = arith.addf %45, %50 : vector<64x256xf32>
    %52 = vector.extract_strided_slice %19 {offsets = [1, 0, 0], sizes = [4, 16, 128], strides = [1, 1, 1]} : vector<6x16x128xbf16> to vector<4x16x128xbf16>
    %53 = vector.shape_cast %52 : vector<4x16x128xbf16> to vector<64x128xbf16>
    %c2_32 = arith.constant 2 : index
    %c0_33 = arith.constant 0 : index
    %c0_34 = arith.constant 0 : index
    %54 = vector.load %arg4[%c2_32, %c0_33, %c0_34] : memref<5x128x256xbf16, #tpu.memory_space<vmem>>, vector<1x128x256xbf16>
    %55 = vector.shape_cast %54 : vector<1x128x256xbf16> to vector<128x256xbf16>
    %cst_35 = arith.constant dense<0.000000e+00> : vector<64x256xf32>
    %56 = tpu.matmul %53, %55, %cst_35 {dimension_numbers = #tpu.dot_dimension_numbers<[1], [0], [0], [1], [0, 0, 1, 1], [], []>} : vector<64x128xbf16>, vector<128x256xbf16>, vector<64x256xf32> -> vector<64x256xf32>
    %57 = arith.addf %51, %56 : vector<64x256xf32>
    %58 = vector.extract_strided_slice %37 {offsets = [1, 0, 0], sizes = [4, 16, 128], strides = [1, 1, 1]} : vector<6x16x128xbf16> to vector<4x16x128xbf16>
    %59 = vector.shape_cast %58 : vector<4x16x128xbf16> to vector<64x128xbf16>
    %c3_36 = arith.constant 3 : index
    %c0_37 = arith.constant 0 : index
    %c0_38 = arith.constant 0 : index
    %60 = vector.load %arg4[%c3_36, %c0_37, %c0_38] : memref<5x128x256xbf16, #tpu.memory_space<vmem>>, vector<1x128x256xbf16>
    %61 = vector.shape_cast %60 : vector<1x128x256xbf16> to vector<128x256xbf16>
    %cst_39 = arith.constant dense<0.000000e+00> : vector<64x256xf32>
    %62 = tpu.matmul %59, %61, %cst_39 {dimension_numbers = #tpu.dot_dimension_numbers<[1], [0], [0], [1], [0, 0, 1, 1], [], []>} : vector<64x128xbf16>, vector<128x256xbf16>, vector<64x256xf32> -> vector<64x256xf32>
    %63 = arith.addf %57, %62 : vector<64x256xf32>
    %64 = vector.extract_strided_slice %19 {offsets = [2, 0, 0], sizes = [4, 16, 128], strides = [1, 1, 1]} : vector<6x16x128xbf16> to vector<4x16x128xbf16>
    %65 = vector.shape_cast %64 : vector<4x16x128xbf16> to vector<64x128xbf16>
    %c4 = arith.constant 4 : index
    %c0_40 = arith.constant 0 : index
    %c0_41 = arith.constant 0 : index
    %66 = vector.load %arg4[%c4, %c0_40, %c0_41] : memref<5x128x256xbf16, #tpu.memory_space<vmem>>, vector<1x128x256xbf16>
    %67 = vector.shape_cast %66 : vector<1x128x256xbf16> to vector<128x256xbf16>
    %cst_42 = arith.constant dense<0.000000e+00> : vector<64x256xf32>
    %68 = tpu.matmul %65, %67, %cst_42 {dimension_numbers = #tpu.dot_dimension_numbers<[1], [0], [0], [1], [0, 0, 1, 1], [], []>} : vector<64x128xbf16>, vector<128x256xbf16>, vector<64x256xf32> -> vector<64x256xf32>
    %69 = arith.addf %63, %68 : vector<64x256xf32>
    %cst_43 = arith.constant 0.000000e+00 : f32
    %70 = vector.broadcast %cst_43 : f32 to vector<64x256xf32>
    %71 = vector.extract_strided_slice %37 {offsets = [0, 0, 0], sizes = [4, 16, 128], strides = [1, 1, 1]} : vector<6x16x128xbf16> to vector<4x16x128xbf16>
    %72 = vector.shape_cast %71 : vector<4x16x128xbf16> to vector<64x128xbf16>
    %c0_44 = arith.constant 0 : index
    %c0_45 = arith.constant 0 : index
    %c0_46 = arith.constant 0 : index
    %73 = vector.load %arg4[%c0_44, %c0_45, %c0_46] : memref<5x128x256xbf16, #tpu.memory_space<vmem>>, vector<1x128x256xbf16>
    %74 = vector.shape_cast %73 : vector<1x128x256xbf16> to vector<128x256xbf16>
    %cst_47 = arith.constant dense<0.000000e+00> : vector<64x256xf32>
    %75 = tpu.matmul %72, %74, %cst_47 {dimension_numbers = #tpu.dot_dimension_numbers<[1], [0], [0], [1], [0, 0, 1, 1], [], []>} : vector<64x128xbf16>, vector<128x256xbf16>, vector<64x256xf32> -> vector<64x256xf32>
    %76 = arith.addf %70, %75 : vector<64x256xf32>
    %77 = vector.extract_strided_slice %19 {offsets = [1, 0, 0], sizes = [4, 16, 128], strides = [1, 1, 1]} : vector<6x16x128xbf16> to vector<4x16x128xbf16>
    %78 = vector.shape_cast %77 : vector<4x16x128xbf16> to vector<64x128xbf16>
    %c1_48 = arith.constant 1 : index
    %c0_49 = arith.constant 0 : index
    %c0_50 = arith.constant 0 : index
    %79 = vector.load %arg4[%c1_48, %c0_49, %c0_50] : memref<5x128x256xbf16, #tpu.memory_space<vmem>>, vector<1x128x256xbf16>
    %80 = vector.shape_cast %79 : vector<1x128x256xbf16> to vector<128x256xbf16>
    %cst_51 = arith.constant dense<0.000000e+00> : vector<64x256xf32>
    %81 = tpu.matmul %78, %80, %cst_51 {dimension_numbers = #tpu.dot_dimension_numbers<[1], [0], [0], [1], [0, 0, 1, 1], [], []>} : vector<64x128xbf16>, vector<128x256xbf16>, vector<64x256xf32> -> vector<64x256xf32>
    %82 = arith.addf %76, %81 : vector<64x256xf32>
    %83 = vector.extract_strided_slice %37 {offsets = [1, 0, 0], sizes = [4, 16, 128], strides = [1, 1, 1]} : vector<6x16x128xbf16> to vector<4x16x128xbf16>
    %84 = vector.shape_cast %83 : vector<4x16x128xbf16> to vector<64x128xbf16>
    %c2_52 = arith.constant 2 : index
    %c0_53 = arith.constant 0 : index
    %c0_54 = arith.constant 0 : index
    %85 = vector.load %arg4[%c2_52, %c0_53, %c0_54] : memref<5x128x256xbf16, #tpu.memory_space<vmem>>, vector<1x128x256xbf16>
    %86 = vector.shape_cast %85 : vector<1x128x256xbf16> to vector<128x256xbf16>
    %cst_55 = arith.constant dense<0.000000e+00> : vector<64x256xf32>
    %87 = tpu.matmul %84, %86, %cst_55 {dimension_numbers = #tpu.dot_dimension_numbers<[1], [0], [0], [1], [0, 0, 1, 1], [], []>} : vector<64x128xbf16>, vector<128x256xbf16>, vector<64x256xf32> -> vector<64x256xf32>
    %88 = arith.addf %82, %87 : vector<64x256xf32>
    %89 = vector.extract_strided_slice %19 {offsets = [2, 0, 0], sizes = [4, 16, 128], strides = [1, 1, 1]} : vector<6x16x128xbf16> to vector<4x16x128xbf16>
    %90 = vector.shape_cast %89 : vector<4x16x128xbf16> to vector<64x128xbf16>
    %c3_56 = arith.constant 3 : index
    %c0_57 = arith.constant 0 : index
    %c0_58 = arith.constant 0 : index
    %91 = vector.load %arg4[%c3_56, %c0_57, %c0_58] : memref<5x128x256xbf16, #tpu.memory_space<vmem>>, vector<1x128x256xbf16>
    %92 = vector.shape_cast %91 : vector<1x128x256xbf16> to vector<128x256xbf16>
    %cst_59 = arith.constant dense<0.000000e+00> : vector<64x256xf32>
    %93 = tpu.matmul %90, %92, %cst_59 {dimension_numbers = #tpu.dot_dimension_numbers<[1], [0], [0], [1], [0, 0, 1, 1], [], []>} : vector<64x128xbf16>, vector<128x256xbf16>, vector<64x256xf32> -> vector<64x256xf32>
    %94 = arith.addf %88, %93 : vector<64x256xf32>
    %95 = vector.extract_strided_slice %37 {offsets = [2, 0, 0], sizes = [4, 16, 128], strides = [1, 1, 1]} : vector<6x16x128xbf16> to vector<4x16x128xbf16>
    %96 = vector.shape_cast %95 : vector<4x16x128xbf16> to vector<64x128xbf16>
    %c4_60 = arith.constant 4 : index
    %c0_61 = arith.constant 0 : index
    %c0_62 = arith.constant 0 : index
    %97 = vector.load %arg4[%c4_60, %c0_61, %c0_62] : memref<5x128x256xbf16, #tpu.memory_space<vmem>>, vector<1x128x256xbf16>
    %98 = vector.shape_cast %97 : vector<1x128x256xbf16> to vector<128x256xbf16>
    %cst_63 = arith.constant dense<0.000000e+00> : vector<64x256xf32>
    %99 = tpu.matmul %96, %98, %cst_63 {dimension_numbers = #tpu.dot_dimension_numbers<[1], [0], [0], [1], [0, 0, 1, 1], [], []>} : vector<64x128xbf16>, vector<128x256xbf16>, vector<64x256xf32> -> vector<64x256xf32>
    %100 = arith.addf %94, %99 : vector<64x256xf32>
    %101 = arith.maximumf %69, %100 : vector<64x256xf32>
    %102 = vector.extract_strided_slice %101 {offsets = [0, 0], sizes = [64, 128], strides = [1, 1]} : vector<64x256xf32> to vector<64x128xf32>
    %103 = vector.extract_strided_slice %101 {offsets = [0, 128], sizes = [64, 128], strides = [1, 1]} : vector<64x256xf32> to vector<64x128xf32>
    %104 = arith.maximumf %102, %103 : vector<64x128xf32>
    %105 = vector.broadcast %38 : vector<1x128xf32> to vector<64x128xf32>
    %106 = arith.addf %104, %105 : vector<64x128xf32>
    %cst_64 = arith.constant 0.000000e+00 : f32
    %107 = vector.broadcast %cst_64 : f32 to vector<64x128xf32>
    %108 = arith.maximumf %106, %107 : vector<64x128xf32>
    %109 = arith.truncf %108 : vector<64x128xf32> to vector<64x128xbf16>
    %110 = vector.shape_cast %109 : vector<64x128xbf16> to vector<4x16x128xbf16>
    %cst_65 = arith.constant 0.000000e+00 : f32
    %111 = vector.broadcast %cst_65 : f32 to vector<16x64xf32>
    %112 = vector.extract_strided_slice %110 {offsets = [0, 0, 0], sizes = [1, 16, 128], strides = [1, 1, 1]} : vector<4x16x128xbf16> to vector<1x16x128xbf16>
    %113 = vector.shape_cast %112 : vector<1x16x128xbf16> to vector<16x128xbf16>
    %c0_66 = arith.constant 0 : index
    %c0_67 = arith.constant 0 : index
    %c0_68 = arith.constant 0 : index
    %114 = vector.load %arg6[%c0_66, %c0_67, %c0_68] : memref<4x128x64xbf16, #tpu.memory_space<vmem>>, vector<1x128x64xbf16>
    %115 = vector.shape_cast %114 : vector<1x128x64xbf16> to vector<128x64xbf16>
    %cst_69 = arith.constant dense<0.000000e+00> : vector<16x64xf32>
    %116 = tpu.matmul %113, %115, %cst_69 {dimension_numbers = #tpu.dot_dimension_numbers<[1], [0], [0], [1], [0, 0, 1, 1], [], []>} : vector<16x128xbf16>, vector<128x64xbf16>, vector<16x64xf32> -> vector<16x64xf32>
    %117 = arith.addf %111, %116 : vector<16x64xf32>
    %118 = vector.extract_strided_slice %110 {offsets = [1, 0, 0], sizes = [1, 16, 128], strides = [1, 1, 1]} : vector<4x16x128xbf16> to vector<1x16x128xbf16>
    %119 = vector.shape_cast %118 : vector<1x16x128xbf16> to vector<16x128xbf16>
    %c1_70 = arith.constant 1 : index
    %c0_71 = arith.constant 0 : index
    %c0_72 = arith.constant 0 : index
    %120 = vector.load %arg6[%c1_70, %c0_71, %c0_72] : memref<4x128x64xbf16, #tpu.memory_space<vmem>>, vector<1x128x64xbf16>
    %121 = vector.shape_cast %120 : vector<1x128x64xbf16> to vector<128x64xbf16>
    %cst_73 = arith.constant dense<0.000000e+00> : vector<16x64xf32>
    %122 = tpu.matmul %119, %121, %cst_73 {dimension_numbers = #tpu.dot_dimension_numbers<[1], [0], [0], [1], [0, 0, 1, 1], [], []>} : vector<16x128xbf16>, vector<128x64xbf16>, vector<16x64xf32> -> vector<16x64xf32>
    %123 = arith.addf %117, %122 : vector<16x64xf32>
    %124 = vector.extract_strided_slice %110 {offsets = [2, 0, 0], sizes = [1, 16, 128], strides = [1, 1, 1]} : vector<4x16x128xbf16> to vector<1x16x128xbf16>
    %125 = vector.shape_cast %124 : vector<1x16x128xbf16> to vector<16x128xbf16>
    %c2_74 = arith.constant 2 : index
    %c0_75 = arith.constant 0 : index
    %c0_76 = arith.constant 0 : index
    %126 = vector.load %arg6[%c2_74, %c0_75, %c0_76] : memref<4x128x64xbf16, #tpu.memory_space<vmem>>, vector<1x128x64xbf16>
    %127 = vector.shape_cast %126 : vector<1x128x64xbf16> to vector<128x64xbf16>
    %cst_77 = arith.constant dense<0.000000e+00> : vector<16x64xf32>
    %128 = tpu.matmul %125, %127, %cst_77 {dimension_numbers = #tpu.dot_dimension_numbers<[1], [0], [0], [1], [0, 0, 1, 1], [], []>} : vector<16x128xbf16>, vector<128x64xbf16>, vector<16x64xf32> -> vector<16x64xf32>
    %129 = arith.addf %123, %128 : vector<16x64xf32>
    %130 = vector.extract_strided_slice %110 {offsets = [3, 0, 0], sizes = [1, 16, 128], strides = [1, 1, 1]} : vector<4x16x128xbf16> to vector<1x16x128xbf16>
    %131 = vector.shape_cast %130 : vector<1x16x128xbf16> to vector<16x128xbf16>
    %c3_78 = arith.constant 3 : index
    %c0_79 = arith.constant 0 : index
    %c0_80 = arith.constant 0 : index
    %132 = vector.load %arg6[%c3_78, %c0_79, %c0_80] : memref<4x128x64xbf16, #tpu.memory_space<vmem>>, vector<1x128x64xbf16>
    %133 = vector.shape_cast %132 : vector<1x128x64xbf16> to vector<128x64xbf16>
    %cst_81 = arith.constant dense<0.000000e+00> : vector<16x64xf32>
    %134 = tpu.matmul %131, %133, %cst_81 {dimension_numbers = #tpu.dot_dimension_numbers<[1], [0], [0], [1], [0, 0, 1, 1], [], []>} : vector<16x128xbf16>, vector<128x64xbf16>, vector<16x64xf32> -> vector<16x64xf32>
    %135 = arith.addf %129, %134 : vector<16x64xf32>
    %c0_82 = arith.constant 0 : index
    %c0_83 = arith.constant 0 : index
    %136 = vector.load %arg7[%c0_82, %c0_83] : memref<1x64xf32, #tpu.memory_space<vmem>>, vector<1x64xf32>
    %137 = vector.broadcast %136 : vector<1x64xf32> to vector<16x64xf32>
    %138 = arith.addf %135, %137 : vector<16x64xf32>
    %cst_84 = arith.constant 0.000000e+00 : f32
    %139 = vector.broadcast %cst_84 : f32 to vector<16x64xf32>
    %140 = arith.maximumf %138, %139 : vector<16x64xf32>
    %141 = arith.truncf %140 : vector<16x64xf32> to vector<16x64xbf16>
    %c0_85 = arith.constant 0 : index
    %c0_86 = arith.constant 0 : index
    %142 = vector.load %arg8[%c0_85, %c0_86] : memref<64x10xbf16, #tpu.memory_space<vmem>>, vector<64x10xbf16>
    %cst_87 = arith.constant dense<0.000000e+00> : vector<16x10xf32>
    %143 = tpu.matmul %141, %142, %cst_87 {dimension_numbers = #tpu.dot_dimension_numbers<[1], [0], [0], [1], [0, 0, 1, 1], [], []>} : vector<16x64xbf16>, vector<64x10xbf16>, vector<16x10xf32> -> vector<16x10xf32>
    %c0_88 = arith.constant 0 : index
    %c0_89 = arith.constant 0 : index
    %144 = vector.load %arg9[%c0_88, %c0_89] : memref<1x10xf32, #tpu.memory_space<vmem>>, vector<1x10xf32>
    %145 = vector.broadcast %144 : vector<1x10xf32> to vector<16x10xf32>
    %146 = arith.addf %143, %145 : vector<16x10xf32>
    %cst_90 = arith.constant dense<0xFF800000> : vector<16xf32>
    %147 = vector.multi_reduction <maximumf>, %146, %cst_90 [1] : vector<16x10xf32> to vector<16xf32>
    %148 = vector.shape_cast %147 : vector<16xf32> to vector<16x1xf32>
    %149 = vector.broadcast %148 : vector<16x1xf32> to vector<16x10xf32>
    %150 = arith.subf %146, %149 : vector<16x10xf32>
    %151 = math.exp %150 : vector<16x10xf32>
    %cst_91 = arith.constant dense<0.000000e+00> : vector<16xf32>
    %152 = vector.multi_reduction <add>, %151, %cst_91 [1] : vector<16x10xf32> to vector<16xf32>
    %153 = vector.shape_cast %152 : vector<16xf32> to vector<16x1xf32>
    %154 = math.log %153 : vector<16x1xf32>
    %155 = vector.broadcast %154 : vector<16x1xf32> to vector<16x10xf32>
    %156 = arith.subf %150, %155 : vector<16x10xf32>
    %c0_92 = arith.constant 0 : index
    %c0_93 = arith.constant 0 : index
    %157 = vector.load %arg10[%c0_92, %c0_93] : memref<16x10xf32, #tpu.memory_space<vmem>>, vector<16x10xf32>
    tpu.vector_store %arg10[%c0_92, %c0_93], %156 {strides = array<i32>} : memref<16x10xf32, #tpu.memory_space<vmem>>, vector<16x10xf32>,
    return
  }
  func.func @transform_0(%arg0: i32) -> (i32, i32, i32, i32) {
    %c0_i32 = arith.constant 0 : i32
    %c0_i32_0 = arith.constant 0 : i32
    %c0_i32_1 = arith.constant 0 : i32
    %c0_i32_2 = arith.constant 0 : i32
    return %c0_i32, %c0_i32_0, %arg0, %c0_i32_1 : i32, i32, i32, i32
  }
  func.func @transform_1(%arg0: i32) -> (i32, i32) {
    %c0_i32 = arith.constant 0 : i32
    %c0_i32_0 = arith.constant 0 : i32
    %c0_i32_1 = arith.constant 0 : i32
    return %c0_i32, %c0_i32_0 : i32, i32
  }
  func.func @transform_2(%arg0: i32) -> (i32, i32) {
    %c0_i32 = arith.constant 0 : i32
    %c0_i32_0 = arith.constant 0 : i32
    %c0_i32_1 = arith.constant 0 : i32
    return %c0_i32, %c0_i32_0 : i32, i32
  }
  func.func @transform_3(%arg0: i32) -> (i32, i32, i32) {
    %c0_i32 = arith.constant 0 : i32
    %c0_i32_0 = arith.constant 0 : i32
    %c0_i32_1 = arith.constant 0 : i32
    %c0_i32_2 = arith.constant 0 : i32
    return %c0_i32, %c0_i32_0, %c0_i32_1 : i32, i32, i32
  }
  func.func @transform_4(%arg0: i32) -> (i32, i32) {
    %c0_i32 = arith.constant 0 : i32
    %c0_i32_0 = arith.constant 0 : i32
    %c0_i32_1 = arith.constant 0 : i32
    return %c0_i32, %c0_i32_0 : i32, i32
  }
  func.func @transform_5(%arg0: i32) -> (i32, i32, i32) {
    %c0_i32 = arith.constant 0 : i32
    %c0_i32_0 = arith.constant 0 : i32
    %c0_i32_1 = arith.constant 0 : i32
    %c0_i32_2 = arith.constant 0 : i32
    return %c0_i32, %c0_i32_0, %c0_i32_1 : i32, i32, i32
  }
  func.func @transform_6(%arg0: i32) -> (i32, i32) {
    %c0_i32 = arith.constant 0 : i32
    %c0_i32_0 = arith.constant 0 : i32
    %c0_i32_1 = arith.constant 0 : i32
    return %c0_i32, %c0_i32_0 : i32, i32
  }
  func.func @transform_7(%arg0: i32) -> (i32, i32) {
    %c0_i32 = arith.constant 0 : i32
    %c0_i32_0 = arith.constant 0 : i32
    %c0_i32_1 = arith.constant 0 : i32
    return %c0_i32, %c0_i32_0 : i32, i32
  }
  func.func @transform_8(%arg0: i32) -> (i32, i32) {
    %c0_i32 = arith.constant 0 : i32
    %c0_i32_0 = arith.constant 0 : i32
    %c0_i32_1 = arith.constant 0 : i32
    return %c0_i32, %c0_i32_0 : i32, i32
  }
  func.func @transform_9(%arg0: i32) -> (i32, i32) {
    %c0_i32 = arith.constant 0 : i32
    %c0_i32_0 = arith.constant 0 : i32
    return %arg0, %c0_i32 : i32, i32
  }
}

</mosaic_0001>

<bundles_post_ra>
// kernel: cnn1_forward.1
= control target key start
LH: loop header
LB: loop body
LE: loop exit
PB: predicated region body
PF: predicated region fallthrough
CT: control target
= control target key end

     0   :  { %vm206_vm0 = vcmask 97280   ;;  %vm225_vm1 = vcmask 1045504   ;;  %vm3804_vm2 = vmmov 0   ;;  %vm2836_vm3 = vcmask 523264   ;;  %s4956_s1 = inlined_call_operand.vmem [shape: bf16[140,256], index: 1, kind: input, shape index: {}]   ;;  %s4957_s0 = inlined_call_operand.vmem [shape: bf16[4,6,16,140], index: 0, kind: input, shape index: {}]   ;;  %s4958_s3 = inlined_call_operand.vmem [shape: bf16[5,128,256], index: 3, kind: input, shape index: {}]   ;;  %s4959_s2 = inlined_call_operand.vmem [shape: f32[1,128], index: 2, kind: input, shape index: {}]   ;;  %s4960_s5 = inlined_call_operand.vmem [shape: bf16[4,128,64], index: 5, kind: input, shape index: {}]   ;;  %s4961_s4 = inlined_call_operand.vmem [shape: f32[1,128], index: 4, kind: input, shape index: {}]   ;;  %s4962_s7 = inlined_call_operand.vmem [shape: bf16[64,10], index: 7, kind: input, shape index: {}]   ;;  %s4963_s6 = inlined_call_operand.vmem [shape: f32[1,64], index: 6, kind: input, shape index: {}]   ;;  %s4964_s8 = inlined_call_operand.vmem [shape: f32[1,10], index: 8, kind: input, shape index: {}]   ;;  %s4965_s9 = inlined_call_operand.vmem [shape: f32[16,10], index: 9, kind: output, shape index: {}]  }
   0x1   :  { %v3858_v0 = vld [vmem:[%s4956_s1 + $0x4] ss:$8 sps:$4 sm:$0xff]   ;;  %v3863_v1 = vld [vmem:[%s4956_s1] ss:$8 sps:$4 sm:$0xff]   ;;  %v3870_v2 = vld [vmem:[%s4956_s1 + $0x14] ss:$8 sps:$4 sm:$0xff]  }
   0x2   :  { %232 = vmatprep.subr.bf16.mxu0 %v3858_v0  ;;  %410 = vmatprep.subr.bf16.mxu1 %v3858_v0  ;;  %v3877_v3 = vld [vmem:[%s4956_s1 + $0x10] ss:$8 sps:$4 sm:$0xff]   ;;  %v3884_v4 = vld [vmem:[%s4956_s1 + $0x24] ss:$8 sps:$4 sm:$0xff]   ;;  %v3891_v5 = vld [vmem:[%s4956_s1 + $0x20] ss:$8 sps:$4 sm:$0xff]  }
   0x3   :  { %233 = vmatpush1.bf16.msra.mxu0 %v3863_v1  ;;  %411 = vmatpush1.bf16.msra.mxu1 %v3863_v1  ;;  %v3898_v6 = vld [vmem:[%s4956_s1 + $0x34] ss:$8 sps:$4 sm:$0xff]   ;;  %v3905_v7 = vld [vmem:[%s4956_s1 + $0x30] ss:$8 sps:$4 sm:$0xff]   ;;  %v3912_v8 = vld [vmem:[%s4956_s1 + $0x44] ss:$8 sps:$4 sm:$0xff]  }
   0x4   :  { %234 = vmatprep.subr.bf16.mxu0 %v3870_v2  ;;  %412 = vmatprep.subr.bf16.mxu1 %v3870_v2  ;;  %v3568_v9 = vld [vmem:[%s4957_s0 + $0x4] ss:$8 sps:$4 sm:$0xff]   ;;  %v3925_v11 = vld [vmem:[%s4956_s1 + $0x40] ss:$8 sps:$4 sm:$0xff]   ;;  %v3932_v12 = vld [vmem:[%s4956_s1 + $0x54] ss:$8 sps:$4 sm:$0xff]  }
   0x5   :  { %v3571_v10 = vld [vmem:[%s4957_s0 + $0x64] ss:$8 sps:$4 sm:$0xff]   ;;  %2943 = vmatprep.mubr.msk.bf16.mxu0 %vm206_vm0, %v3568_v9  ;;  %v3941_v13 = vld [vmem:[%s4956_s1 + $0x50] ss:$8 sps:$4 sm:$0xff]   ;;  %v3955_v15 = vld [vmem:[%s4956_s1 + $0x60] ss:$8 sps:$4 sm:$0xff]  }
   0x6   :  { %2974 = vmatprep.mubr.msk.bf16.mxu1 %vm206_vm0, %v3571_v10  ;;  %v3948_v14 = vld [vmem:[%s4956_s1 + $0x64] ss:$8 sps:$4 sm:$0xff]   ;;  %v3962_v16 = vld [vmem:[%s4956_s1 + $0x74] ss:$8 sps:$4 sm:$0xff]   ;;  %v3969_v17 = vld [vmem:[%s4956_s1 + $0x70] ss:$8 sps:$4 sm:$0xff]  }
   0x7   :  { %235 = vmatpush1.bf16.msra.mxu0 %v3877_v3  ;;  %413 = vmatpush1.bf16.msra.mxu1 %v3877_v3  ;;  %v3974_v18 = vld [vmem:[%s4956_s1 + $0x84] ss:$8 sps:$4 sm:$0x3f]   ;;  %v3565_v19 = vld [vmem:[%s4956_s1 + $0x80] ss:$8 sps:$4 sm:$0x3f]  }
   0x8   :  { %236 = vmatprep.subr.bf16.mxu0 %v3884_v4  ;;  %414 = vmatprep.subr.bf16.mxu1 %v3884_v4  ;;  %v3988_v20 = vsel %vm225_vm1, %v3565_v19, 0  ;;  %v3566_v21 = vld [vmem:[%s4957_s0] ss:$8 sps:$4 sm:$0xff]   ;;  %v3572_v23 = vld [vmem:[%s4957_s0 + $0x14] ss:$8 sps:$4 sm:$0xff]   ;;  %v3802_v19 = vmov 0  }
   0x9   :  { %v3569_v22 = vld [vmem:[%s4957_s0 + $0x60] ss:$8 sps:$4 sm:$0xff]   ;;  %v3574_v24 = vld [vmem:[%s4957_s0 + $0x74] ss:$8 sps:$4 sm:$0xff]   ;;  %v3576_v25 = vld [vmem:[%s4957_s0 + $0x10] ss:$8 sps:$4 sm:$0xff]  }
   0xa   :  { %v3577_v26 = vld [vmem:[%s4957_s0 + $0x70] ss:$8 sps:$4 sm:$0xff]   ;;  %v3578_v27 = vld [vmem:[%s4957_s0 + $0x24] ss:$8 sps:$4 sm:$0xff]   ;;  %v3582_v29 = vld [vmem:[%s4957_s0 + $0x20] ss:$8 sps:$4 sm:$0xff]  }
   0xb   :  { %237 = vmatpush1.bf16.msra.mxu0 %v3891_v5  ;;  %415 = vmatpush1.bf16.msra.mxu1 %v3891_v5  ;;  %v3580_v28 = vld [vmem:[%s4957_s0 + $0x84] ss:$8 sps:$4 sm:$0xff]   ;;  %v3583_v30 = vld [vmem:[%s4957_s0 + $0x80] ss:$8 sps:$4 sm:$0xff]   ;;  %v3584_v31 = vld [vmem:[%s4957_s0 + $0x34] ss:$8 sps:$4 sm:$0xff]  }
   0xc   :  { %238 = vmatprep.subr.bf16.mxu0 %v3898_v6  ;;  %416 = vmatprep.subr.bf16.mxu1 %v3898_v6  ;;  %v3586_v32 = vld [vmem:[%s4957_s0 + $0x94] ss:$8 sps:$4 sm:$0xff]   ;;  %v3588_v33 = vld [vmem:[%s4957_s0 + $0x30] ss:$8 sps:$4 sm:$0xff]   ;;  %v3590_v35 = vld [vmem:[%s4957_s0 + $0x44] ss:$8 sps:$4 sm:$0xff]  }
   0xd   :  { %v3589_v34 = vld [vmem:[%s4957_s0 + $0x90] ss:$8 sps:$4 sm:$0xff]   ;;  %v3592_v36 = vld [vmem:[%s4957_s0 + $0xa4] ss:$8 sps:$4 sm:$0xff]   ;;  %v3594_v37 = vld [vmem:[%s4957_s0 + $0x40] ss:$8 sps:$4 sm:$0xff]  }
   0xe   :  { %v3595_v38 = vld [vmem:[%s4957_s0 + $0xa0] ss:$8 sps:$4 sm:$0xff]   ;;  %v3596_v39 = vld [vmem:[%s4957_s0 + $0x54] ss:$8 sps:$4 sm:$0xff]   ;;  %v3640_v41 = vld [vmem:[%s4958_s3 + $0x84] ss:$8 sps:$4 sm:$0xff]  }
   0xf   :  { %239 = vmatpush1.bf16.msra.mxu0 %v3905_v7  ;;  %417 = vmatpush1.bf16.msra.mxu1 %v3905_v7  ;;  %v3598_v40 = vld [vmem:[%s4957_s0 + $0xb4] ss:$8 sps:$4 sm:$0xff]   ;;  %v3600_v42 = vld [vmem:[%s4957_s0 + $0x50] ss:$8 sps:$4 sm:$0xff]   ;;  %v3604_v44 = vld [vmem:[%s4957_s0 + $0xc4] ss:$8 sps:$4 sm:$0xff]  }
  0x10   :  { %240 = vmatprep.subr.bf16.mxu0 %v3912_v8  ;;  %418 = vmatprep.subr.bf16.mxu1 %v3912_v8  ;;  %v3601_v43 = vld [vmem:[%s4957_s0 + $0xb0] ss:$8 sps:$4 sm:$0xff]   ;;  %v3607_v45 = vld [vmem:[%s4957_s0 + $0x124] ss:$8 sps:$4 sm:$0xff]   ;;  %v3602_v46 = vld [vmem:[%s4957_s0 + $0xc0] ss:$8 sps:$4 sm:$0xff]  }
  0x11   :  { %v3605_v47 = vld [vmem:[%s4957_s0 + $0x120] ss:$8 sps:$4 sm:$0xff]   ;;  %v3608_v48 = vld [vmem:[%s4957_s0 + $0xd4] ss:$8 sps:$4 sm:$0xff]   ;;  %v3641_v52 = vld [vmem:[%s4958_s3 + $0x90] ss:$8 sps:$4 sm:$0xff]  }
  0x12   :  { %v3610_v49 = vld [vmem:[%s4957_s0 + $0x134] ss:$8 sps:$4 sm:$0xff]   ;;  %v3638_v50 = vld [vmem:[%s4958_s3 + $0x80] ss:$8 sps:$4 sm:$0xff]   ;;  %v3646_v53 = vld [vmem:[%s4958_s3 + $0xa4] ss:$8 sps:$4 sm:$0xff]  }
  0x13   :  { %241 = vmatpush1.bf16.msra.mxu0 %v3925_v11  ;;  %419 = vmatpush1.bf16.msra.mxu1 %v3925_v11  ;;  %v3643_v51 = vld [vmem:[%s4958_s3 + $0x94] ss:$8 sps:$4 sm:$0xff]   ;;  %v3612_v54 = vld [vmem:[%s4957_s0 + $0xd0] ss:$8 sps:$4 sm:$0xff]   ;;  %v3614_v56 = vld [vmem:[%s4957_s0 + $0xe4] ss:$8 sps:$4 sm:$0xff]  }
  0x14   :  { %242 = vmatprep.subr.bf16.mxu0 %v3932_v12  ;;  %420 = vmatprep.subr.bf16.mxu1 %v3932_v12  ;;  %v3613_v55 = vld [vmem:[%s4957_s0 + $0x130] ss:$8 sps:$4 sm:$0xff]   ;;  %v3616_v57 = vld [vmem:[%s4957_s0 + $0x144] ss:$8 sps:$4 sm:$0xff]   ;;  %v3644_v58 = vld [vmem:[%s4958_s3 + $0xa0] ss:$8 sps:$4 sm:$0xff]  }
  0x15   :  { %v3618_v59 = vld [vmem:[%s4957_s0 + $0xe0] ss:$8 sps:$4 sm:$0xff]   ;;  %v3620_v61 = vld [vmem:[%s4957_s0 + $0xf4] ss:$8 sps:$4 sm:$0xff]   ;;  %v3624_v63 = vld [vmem:[%s4957_s0 + $0xf0] ss:$8 sps:$4 sm:$0xff]  }
  0x16   :  { %v3619_v60 = vld [vmem:[%s4957_s0 + $0x140] ss:$8 sps:$4 sm:$0xff]   ;;  %v3622_v62 = vld [vmem:[%s4957_s0 + $0x154] ss:$8 sps:$4 sm:$0xff]   ;;  %v3637_v9 = vld [vmem:[%s4957_s0 + $0x170] ss:$8 sps:$4 sm:$0xff]  }
  0x17   :  { %243 = vmatpush1.bf16.msra.mxu0 %v3941_v13  ;;  %421 = vmatpush1.bf16.msra.mxu1 %v3941_v13  ;;  %v3647_v10 = vld [vmem:[%s4958_s3 + $0xb0] ss:$8 sps:$4 sm:$0xff]   ;;  %vm2881_vm4 = vcmask 80896  }
  0x18   :  { %244 = vmatprep.subr.bf16.mxu0 %v3948_v14  ;;  %422 = vmatprep.subr.bf16.mxu1 %v3948_v14 }
  0x1b   :  { %245 = vmatpush1.bf16.msra.mxu0 %v3955_v15  ;;  %423 = vmatpush1.bf16.msra.mxu1 %v3955_v15 }
  0x1c   :  { %246 = vmatprep.subr.bf16.mxu0 %v3962_v16  ;;  %424 = vmatprep.subr.bf16.mxu1 %v3962_v16 }
  0x1f   :  { %247 = vmatpush1.bf16.msra.mxu0 %v3969_v17  ;;  %425 = vmatpush1.bf16.msra.mxu1 %v3969_v17 }
  0x20   :  { %2942 = vmatprep.subr.msk.bf16.mxu0 %vm225_vm1, %v3974_v18  ;;  %2973 = vmatprep.subr.msk.bf16.mxu1 %vm225_vm1, %v3974_v18 }
  0x23   :  { %249 = vmatpush1.bf16.msra.mxu0 %v3988_v20  ;;  %427 = vmatpush1.bf16.msra.mxu1 %v3988_v20 }
  0x24   :  { %660 = vmatprep.subr.bf16.mxu0 %v3858_v0  ;;  %838 = vmatprep.subr.bf16.mxu1 %v3858_v0  ;;  %v3625_v0 = vld [vmem:[%s4957_s0 + $0x150] ss:$8 sps:$4 sm:$0xff]  }
  0x26   :  { %265 = vmatmul.mubr.bf16.vlgmr.msra.gmra.mrb[0].mxu0 %v3566_v21  ;;  %443 = vmatmul.mubr.bf16.vlgmr.msra.gmra.mrb[0].mxu1 %v3569_v22 }
  0x27   :  { %661 = vmatpush1.bf16.msra.mxu0 %v3863_v1  ;;  %839 = vmatpush1.bf16.msra.mxu1 %v3863_v1  ;;  %v3626_v1 = vld [vmem:[%s4957_s0 + $0x104] ss:$8 sps:$4 sm:$0xff]  }
  0x28   :  { %662 = vmatprep.subr.bf16.mxu0 %v3870_v2  ;;  %840 = vmatprep.subr.bf16.mxu1 %v3870_v2  ;;  %v3628_v2 = vld [vmem:[%s4957_s0 + $0x164] ss:$8 sps:$4 sm:$0xff]  }
  0x29   :  { %2944 = vmatprep.mubr.msk.bf16.mxu0 %vm206_vm0, %v3572_v23  ;;  %2975 = vmatprep.mubr.msk.bf16.mxu1 %vm206_vm0, %v3574_v24 }
  0x2b   :  { %663 = vmatpush1.bf16.msra.mxu0 %v3877_v3  ;;  %841 = vmatpush1.bf16.msra.mxu1 %v3877_v3  ;;  %v3630_v3 = vld [vmem:[%s4957_s0 + $0x100] ss:$8 sps:$4 sm:$0xff]  }
  0x2c   :  { %664 = vmatprep.subr.bf16.mxu0 %v3884_v4  ;;  %842 = vmatprep.subr.bf16.mxu1 %v3884_v4  ;;  %v3631_v4 = vld [vmem:[%s4957_s0 + $0x160] ss:$8 sps:$4 sm:$0xff]  }
  0x2e   :  { %275 = vmatmul.mubr.bf16.gmra.mrb[4].mxu0 %v3576_v25  ;;  %453 = vmatmul.mubr.bf16.gmra.mrb[4].mxu1 %v3577_v26 }
  0x2f   :  { %665 = vmatpush1.bf16.msra.mxu0 %v3891_v5  ;;  %843 = vmatpush1.bf16.msra.mxu1 %v3891_v5  ;;  %v3632_v5 = vld [vmem:[%s4957_s0 + $0x114] ss:$8 sps:$4 sm:$0xff]  }
  0x30   :  { %2945 = vmatprep.mubr.msk.bf16.mxu0 %vm206_vm0, %v3578_v27  ;;  %2976 = vmatprep.mubr.msk.bf16.mxu1 %vm206_vm0, %v3580_v28 }
  0x31   :  { %666 = vmatprep.subr.bf16.mxu0 %v3898_v6  ;;  %844 = vmatprep.subr.bf16.mxu1 %v3898_v6  ;;  %v3634_v6 = vld [vmem:[%s4957_s0 + $0x174] ss:$8 sps:$4 sm:$0xff]  }
  0x33   :  { %667 = vmatpush1.bf16.msra.mxu0 %v3905_v7  ;;  %845 = vmatpush1.bf16.msra.mxu1 %v3905_v7  ;;  %v3649_v7 = vld [vmem:[%s4958_s3 + $0xb4] ss:$8 sps:$4 sm:$0xff]  }
  0x34   :  { %668 = vmatprep.subr.bf16.mxu0 %v3912_v8  ;;  %846 = vmatprep.subr.bf16.mxu1 %v3912_v8  ;;  %v3636_v8 = vld [vmem:[%s4957_s0 + $0x110] ss:$8 sps:$4 sm:$0xff]  }
  0x36   :  { %285 = vmatmul.mubr.bf16.gmra.mrb[8].mxu0 %v3582_v29  ;;  %463 = vmatmul.mubr.bf16.gmra.mrb[8].mxu1 %v3583_v30  ;;  %v4246_v29 = vld [vmem:[%s4959_s2] ss:$0 sm:$0xff] }
  0x37   :  { %2946 = vmatprep.mubr.msk.bf16.mxu0 %vm206_vm0, %v3584_v31  ;;  %2977 = vmatprep.mubr.msk.bf16.mxu1 %vm206_vm0, %v3586_v32 }
  0x38   :  { %669 = vmatpush1.bf16.msra.mxu0 %v3925_v11  ;;  %847 = vmatpush1.bf16.msra.mxu1 %v3925_v11  ;;  %v3652_v11 = vld [vmem:[%s4958_s3 + $0xc4] ss:$8 sps:$4 sm:$0xff]  }
  0x39   :  { %670 = vmatprep.subr.bf16.mxu0 %v3932_v12  ;;  %848 = vmatprep.subr.bf16.mxu1 %v3932_v12  ;;  %v3650_v12 = vld [vmem:[%s4958_s3 + $0xc0] ss:$8 sps:$4 sm:$0xff]  }
  0x3c   :  { %671 = vmatpush1.bf16.msra.mxu0 %v3941_v13  ;;  %849 = vmatpush1.bf16.msra.mxu1 %v3941_v13  ;;  %v3655_v13 = vld [vmem:[%s4958_s3 + $0xd4] ss:$8 sps:$4 sm:$0xff]  }
  0x3d   :  { %672 = vmatprep.subr.bf16.mxu0 %v3948_v14  ;;  %850 = vmatprep.subr.bf16.mxu1 %v3948_v14  ;;  %v3653_v14 = vld [vmem:[%s4958_s3 + $0xd0] ss:$8 sps:$4 sm:$0xff]  }
  0x3e   :  { %295 = vmatmul.mubr.bf16.gmra.mrb[12].mxu0 %v3588_v33  ;;  %473 = vmatmul.mubr.bf16.gmra.mrb[12].mxu1 %v3589_v34 }
  0x3f   :  { %2947 = vmatprep.mubr.msk.bf16.mxu0 %vm206_vm0, %v3590_v35  ;;  %2978 = vmatprep.mubr.msk.bf16.mxu1 %vm206_vm0, %v3592_v36 }
  0x40   :  { %673 = vmatpush1.bf16.msra.mxu0 %v3955_v15  ;;  %851 = vmatpush1.bf16.msra.mxu1 %v3955_v15  ;;  %v3658_v15 = vld [vmem:[%s4958_s3 + $0xe4] ss:$8 sps:$4 sm:$0xff]  }
  0x41   :  { %674 = vmatprep.subr.bf16.mxu0 %v3962_v16  ;;  %852 = vmatprep.subr.bf16.mxu1 %v3962_v16  ;;  %v3656_v16 = vld [vmem:[%s4958_s3 + $0xe0] ss:$8 sps:$4 sm:$0xff]  }
  0x44   :  { %675 = vmatpush1.bf16.msra.mxu0 %v3969_v17  ;;  %853 = vmatpush1.bf16.msra.mxu1 %v3969_v17  ;;  %v3661_v17 = vld [vmem:[%s4958_s3 + $0xf4] ss:$8 sps:$4 sm:$0xff]  }
  0x45   :  { %3005 = vmatprep.subr.msk.bf16.mxu0 %vm225_vm1, %v3974_v18  ;;  %3036 = vmatprep.subr.msk.bf16.mxu1 %vm225_vm1, %v3974_v18  ;;  %v3659_v18 = vld [vmem:[%s4958_s3 + $0xf0] ss:$8 sps:$4 sm:$0xff]  }
  0x46   :  { %305 = vmatmul.mubr.bf16.gmra.mrb[16].mxu0 %v3594_v37  ;;  %483 = vmatmul.mubr.bf16.gmra.mrb[16].mxu1 %v3595_v38 }
  0x47   :  { %2948 = vmatprep.mubr.msk.bf16.mxu0 %vm206_vm0, %v3596_v39  ;;  %2979 = vmatprep.mubr.msk.bf16.mxu1 %vm206_vm0, %v3598_v40 }
  0x48   :  { %677 = vmatpush1.bf16.msra.mxu0 %v3988_v20  ;;  %855 = vmatpush1.bf16.msra.mxu1 %v3988_v20  ;;  %v3664_v20 = vld [vmem:[%s4958_s3 + $0x4] ss:$8 sps:$4 sm:$0xff]  }
  0x49   :  { %1895 = vmatprep.subr.bf16.mxu1 %v3640_v41  ;;  %1111 = vmatprep.subr.bf16.mxu0 %v3640_v41 }
  0x4e   :  { %315 = vmatmul.mubr.bf16.gmra.mrb[20].mxu0 %v3600_v42  ;;  %493 = vmatmul.mubr.bf16.gmra.mrb[20].mxu1 %v3601_v43 }
  0x4f   :  { %3006 = vmatprep.mubr.msk.bf16.mxu0 %vm206_vm0, %v3604_v44  ;;  %3037 = vmatprep.mubr.msk.bf16.mxu1 %vm206_vm0, %v3607_v45 }
  0x56   :  { %693 = vmatmul.mubr.bf16.vlgmr.msra.gmra.mrb[24].mxu0 %v3602_v46  ;;  %871 = vmatmul.mubr.bf16.vlgmr.msra.gmra.mrb[24].mxu1 %v3605_v47 }
  0x57   :  { %3007 = vmatprep.mubr.msk.bf16.mxu0 %vm206_vm0, %v3608_v48  ;;  %3038 = vmatprep.mubr.msk.bf16.mxu1 %vm206_vm0, %v3610_v49 }
  0x58   :  { %1896 = vmatpush1.bf16.msra.mxu1 %v3638_v50  ;;  %1112 = vmatpush1.bf16.msra.mxu0 %v3638_v50 }
  0x59   :  { %1897 = vmatprep.subr.bf16.mxu1 %v3643_v51  ;;  %1113 = vmatprep.subr.bf16.mxu0 %v3643_v51 }
  0x5c   :  { %1898 = vmatpush1.bf16.msra.mxu1 %v3641_v52  ;;  %1114 = vmatpush1.bf16.msra.mxu0 %v3641_v52 }
  0x5d   :  { %1899 = vmatprep.subr.bf16.mxu1 %v3646_v53  ;;  %1115 = vmatprep.subr.bf16.mxu0 %v3646_v53 }
  0x5e   :  { %703 = vmatmul.mubr.bf16.gmra.mrb[28].mxu0 %v3612_v54  ;;  %881 = vmatmul.mubr.bf16.gmra.mrb[28].mxu1 %v3613_v55 }
  0x5f   :  { %3008 = vmatprep.mubr.msk.bf16.mxu0 %vm206_vm0, %v3614_v56  ;;  %3039 = vmatprep.mubr.msk.bf16.mxu1 %vm206_vm0, %v3616_v57 }
  0x60   :  { %1900 = vmatpush1.bf16.msra.mxu1 %v3644_v58  ;;  %1116 = vmatpush1.bf16.msra.mxu0 %v3644_v58 }
  0x61   :  { %1901 = vmatprep.subr.bf16.mxu1 %v3649_v7  ;;  %1117 = vmatprep.subr.bf16.mxu0 %v3649_v7 }
  0x64   :  { %1902 = vmatpush1.bf16.msra.mxu1 %v3647_v10  ;;  %1118 = vmatpush1.bf16.msra.mxu0 %v3647_v10  ;;  %v4264_v10 = vld [vmem:[%s4958_s3 + $0x14] ss:$8 sps:$4 sm:$0xff]  }
  0x65   :  { %1903 = vmatprep.subr.bf16.mxu1 %v3652_v11  ;;  %1119 = vmatprep.subr.bf16.mxu0 %v3652_v11 }
  0x66   :  { %713 = vmatmul.mubr.bf16.gmra.mrb[32].mxu0 %v3618_v59  ;;  %891 = vmatmul.mubr.bf16.gmra.mrb[32].mxu1 %v3619_v60 }
  0x67   :  { %3009 = vmatprep.mubr.msk.bf16.mxu0 %vm206_vm0, %v3620_v61  ;;  %3040 = vmatprep.mubr.msk.bf16.mxu1 %vm206_vm0, %v3622_v62 }
  0x68   :  { %1904 = vmatpush1.bf16.msra.mxu1 %v3650_v12  ;;  %1120 = vmatpush1.bf16.msra.mxu0 %v3650_v12 }
  0x69   :  { %1905 = vmatprep.subr.bf16.mxu1 %v3655_v13  ;;  %1121 = vmatprep.subr.bf16.mxu0 %v3655_v13  ;;  %v4273_v13 = vld [vmem:[%s4958_s3 + $0x10] ss:$8 sps:$4 sm:$0xff]  }
  0x6c   :  { %1906 = vmatpush1.bf16.msra.mxu1 %v3653_v14  ;;  %1122 = vmatpush1.bf16.msra.mxu0 %v3653_v14 }
  0x6d   :  { %1907 = vmatprep.subr.bf16.mxu1 %v3658_v15  ;;  %1123 = vmatprep.subr.bf16.mxu0 %v3658_v15 }
  0x6e   :  { %723 = vmatmul.mubr.bf16.gmra.mrb[36].mxu0 %v3624_v63  ;;  %901 = vmatmul.mubr.bf16.gmra.mrb[36].mxu1 %v3625_v0 }
  0x6f   :  { %3010 = vmatprep.mubr.msk.bf16.mxu0 %vm206_vm0, %v3626_v1  ;;  %3041 = vmatprep.mubr.msk.bf16.mxu1 %vm206_vm0, %v3628_v2 }
  0x70   :  { %1908 = vmatpush1.bf16.msra.mxu1 %v3656_v16  ;;  %1124 = vmatpush1.bf16.msra.mxu0 %v3656_v16 }
  0x71   :  { %1909 = vmatprep.subr.bf16.mxu1 %v3661_v17  ;;  %1125 = vmatprep.subr.bf16.mxu0 %v3661_v17  ;;  %v4280_v17 = vld [vmem:[%s4958_s3 + $0x24] ss:$8 sps:$4 sm:$0xff]  }
  0x74   :  { %1910 = vmatpush1.bf16.msra.mxu1 %v3659_v18  ;;  %1126 = vmatpush1.bf16.msra.mxu0 %v3659_v18 }
  0x75   :  { %1968 = vmatprep.subr.bf16.mxu1 %v3664_v20  ;;  %1264 = vmatprep.subr.bf16.mxu0 %v3664_v20 }
  0x76   :  { %733 = vmatmul.mubr.bf16.gmra.mrb[40].mxu0 %v3630_v3  ;;  %911 = vmatmul.mubr.bf16.gmra.mrb[40].mxu1 %v3631_v4 }
  0x77   :  { %3011 = vmatprep.mubr.msk.bf16.mxu0 %vm206_vm0, %v3632_v5  ;;  %3042 = vmatprep.mubr.msk.bf16.mxu1 %vm206_vm0, %v3634_v6  ;;  %v4257_v6 = vld [vmem:[%s4958_s3] ss:$8 sps:$4 sm:$0xff]  }
  0x7e   :  { %743 = vmatmul.mubr.bf16.gmra.mrb[44].mxu0 %v3636_v8  ;;  %921 = vmatmul.mubr.bf16.gmra.mrb[44].mxu1 %v3637_v9 }
  0x7f   :  { %1927 = vmatprep.mubr.bf16.mxu1 %v3802_v19  ;;  %1143 = vmatprep.mubr.bf16.mxu0 %v3802_v19 }
  0xf9   :  { %v266_v21 = vpop.f32.mrb[0].mxu0  ;;  %v444_v22 = vpop.f32.mrb[0].mxu1 }
  0xfa   :  { %v503_v23 = vmax.f32 %v266_v21, %v444_v22  ;;  %v268_v24 = vpop.f32.mrb[1].mxu0  ;;  %v446_v25 = vpop.f32.mrb[1].mxu1 }
  0xfb   :  { %v504_v26 = vmax.f32 %v268_v24, %v446_v25  ;;  %v270_v27 = vpop.f32.mrb[2].mxu0  ;;  %v448_v28 = vpop.f32.mrb[2].mxu1 }
  0xfc   :  { %v505_v30 = vmax.f32 %v270_v27, %v448_v28  ;;  %v272_v31 = vpop.f32.mrb[3].mxu0  ;;  %v450_v32 = vpop.f32.mrb[3].mxu1 }
  0xfd   :  { %v527_v33 = vmax.f32 %v503_v23, %v504_v26  ;;  %v506_v34 = vmax.f32 %v272_v31, %v450_v32  ;;  %v4286_v31 = vld [vmem:[%s4958_s3 + $0x20] ss:$8 sps:$4 sm:$0xff]  }
  0xff   :  { %v545_v35 = vadd.f32 %v4246_v29, %v527_v33  ;;  %v528_v36 = vmax.f32 %v505_v30, %v506_v34 }
 0x101   :  { %v546_v37 = vadd.f32 %v4246_v29, %v528_v36  ;;  %v276_v38 = vpop.f32.mrb[4].mxu0  ;;  %v454_v39 = vpop.f32.mrb[4].mxu1  ;;  %v557_v43 = vmax.f32 %v545_v35, 0.0  ;;  %v4294_v35 = vld [vmem:[%s4958_s3 + $0x34] ss:$8 sps:$4 sm:$0xff]  }
 0x102   :  { %v507_v40 = vmax.f32 %v276_v38, %v454_v39  ;;  %v278_v41 = vpop.f32.mrb[5].mxu0  ;;  %v456_v42 = vpop.f32.mrb[5].mxu1  ;;  %v4303_v38 = vld [vmem:[%s4958_s3 + $0x30] ss:$8 sps:$4 sm:$0xff]  }
 0x103   :  { %v558_v44 = vmax.f32 %v546_v37, 0.0  ;;  %v508_v45 = vmax.f32 %v278_v41, %v456_v42  ;;  %v280_v46 = vpop.f32.mrb[6].mxu0  ;;  %v458_v47 = vpop.f32.mrb[6].mxu1  ;;  %v4310_v42 = vld [vmem:[%s4958_s3 + $0x44] ss:$8 sps:$4 sm:$0xff]  }
 0x104   :  { %v509_v48 = vmax.f32 %v280_v46, %v458_v47  ;;  %v282_v49 = vpop.f32.mrb[7].mxu0  ;;  %v460_v50 = vpop.f32.mrb[7].mxu1 }
 0x105   :  { %v4250_v51 = vpack.c.bf16 %v558_v44, %v557_v43  ;;  %v529_v52 = vmax.f32 %v507_v40, %v508_v45  ;;  %v510_v53 = vmax.f32 %v282_v49, %v460_v50 }
 0x107   :  { %v547_v54 = vadd.f32 %v4246_v29, %v529_v52  ;;  %v530_v55 = vmax.f32 %v509_v48, %v510_v53 }
 0x109   :  { %v548_v56 = vadd.f32 %v4246_v29, %v530_v55  ;;  %v286_v57 = vpop.f32.mrb[8].mxu0  ;;  %v464_v58 = vpop.f32.mrb[8].mxu1  ;;  %v559_v62 = vmax.f32 %v547_v54, 0.0  ;;  %v4316_v55 = vld [vmem:[%s4958_s3 + $0x40] ss:$8 sps:$4 sm:$0xff]  }
 0x10a   :  { %v511_v59 = vmax.f32 %v286_v57, %v464_v58  ;;  %v288_v60 = vpop.f32.mrb[9].mxu0  ;;  %v466_v61 = vpop.f32.mrb[9].mxu1 }
 0x10b   :  { %v560_v63 = vmax.f32 %v548_v56, 0.0  ;;  %v512_v0 = vmax.f32 %v288_v60, %v466_v61  ;;  %v290_v1 = vpop.f32.mrb[10].mxu0  ;;  %v468_v2 = vpop.f32.mrb[10].mxu1 }
 0x10c   :  { %v513_v3 = vmax.f32 %v290_v1, %v468_v2  ;;  %v292_v4 = vpop.f32.mrb[11].mxu0  ;;  %v470_v5 = vpop.f32.mrb[11].mxu1  ;;  %v4340_v2 = vld [vmem:[%s4958_s3 + $0x64] ss:$8 sps:$4 sm:$0xff]  }
 0x10d   :  { %v4259_v7 = vpack.c.bf16 %v560_v63, %v559_v62  ;;  %v531_v8 = vmax.f32 %v511_v59, %v512_v0  ;;  %v514_v9 = vmax.f32 %v292_v4, %v470_v5  ;;  %v4324_v59 = vld [vmem:[%s4958_s3 + $0x54] ss:$8 sps:$4 sm:$0xff]   ;;  %v4333_v62 = vld [vmem:[%s4958_s3 + $0x50] ss:$8 sps:$4 sm:$0xff]  }
 0x10f   :  { %v549_v11 = vadd.f32 %v4246_v29, %v531_v8  ;;  %v532_v12 = vmax.f32 %v513_v3, %v514_v9  ;;  %1928 = vmatmul.mubr.bf16.vlgmr.msra.gmra.mrb[48].mxu1 %v4259_v7 }
 0x110   :  { %1937 = vmatprep.mubr.bf16.mxu1 %v3802_v19  ;;  %1969 = vmatpush1.bf16.msra.mxu1 %v4257_v6 }
 0x111   :  { %v550_v14 = vadd.f32 %v4246_v29, %v532_v12  ;;  %v296_v15 = vpop.f32.mrb[12].mxu0  ;;  %v474_v16 = vpop.f32.mrb[12].mxu1  ;;  %1970 = vmatprep.subr.bf16.mxu1 %v4264_v10  ;;  %v561_v22 = vmax.f32 %v549_v11, 0.0 }
 0x112   :  { %v515_v18 = vmax.f32 %v296_v15, %v474_v16  ;;  %v298_v20 = vpop.f32.mrb[13].mxu0  ;;  %v476_v21 = vpop.f32.mrb[13].mxu1 }
 0x113   :  { %v562_v23 = vmax.f32 %v550_v14, 0.0  ;;  %v516_v24 = vmax.f32 %v298_v20, %v476_v21  ;;  %v300_v25 = vpop.f32.mrb[14].mxu0  ;;  %v478_v26 = vpop.f32.mrb[14].mxu1  ;;  %v4346_v20 = vld [vmem:[%s4958_s3 + $0x60] ss:$8 sps:$4 sm:$0xff]  }
 0x114   :  { %v517_v27 = vmax.f32 %v300_v25, %v478_v26  ;;  %v302_v28 = vpop.f32.mrb[15].mxu0  ;;  %v480_v30 = vpop.f32.mrb[15].mxu1  ;;  %1971 = vmatpush1.bf16.msra.mxu1 %v4273_v13 }
 0x115   :  { %v4288_v32 = vpack.c.bf16 %v562_v23, %v561_v22  ;;  %v533_v33 = vmax.f32 %v515_v18, %v516_v24  ;;  %v518_v34 = vmax.f32 %v302_v28, %v480_v30  ;;  %1972 = vmatprep.subr.bf16.mxu1 %v4280_v17  ;;  %v4354_v24 = vld [vmem:[%s4958_s3 + $0x74] ss:$8 sps:$4 sm:$0xff]  }
 0x117   :  { %v551_v36 = vadd.f32 %v4246_v29, %v533_v33  ;;  %v534_v37 = vmax.f32 %v517_v27, %v518_v34  ;;  %1938 = vmatmul.mubr.bf16.gmra.mrb[52].mxu1 %v4288_v32  ;;  %v4362_v27 = vld [vmem:[%s4958_s3 + $0x70] ss:$8 sps:$4 sm:$0xff]   ;;  %v4370_v34 = vld [vmem:[%s4958_s3 + $0x104] ss:$8 sps:$4 sm:$0xff]  }
 0x118   :  { %1947 = vmatprep.mubr.bf16.mxu1 %v3802_v19  ;;  %1973 = vmatpush1.bf16.msra.mxu1 %v4286_v31 }
 0x119   :  { %v552_v39 = vadd.f32 %v4246_v29, %v534_v37  ;;  %v306_v40 = vpop.f32.mrb[16].mxu0  ;;  %v484_v41 = vpop.f32.mrb[16].mxu1  ;;  %1974 = vmatprep.subr.bf16.mxu1 %v4294_v35  ;;  %v563_v46 = vmax.f32 %v551_v36, 0.0 }
 0x11a   :  { %v519_v43 = vmax.f32 %v306_v40, %v484_v41  ;;  %v308_v44 = vpop.f32.mrb[17].mxu0  ;;  %v486_v45 = vpop.f32.mrb[17].mxu1 }
 0x11b   :  { %v564_v47 = vmax.f32 %v552_v39, 0.0  ;;  %v520_v48 = vmax.f32 %v308_v44, %v486_v45  ;;  %v310_v49 = vpop.f32.mrb[18].mxu0  ;;  %v488_v50 = vpop.f32.mrb[18].mxu1 }
 0x11c   :  { %v521_v52 = vmax.f32 %v310_v49, %v488_v50  ;;  %v312_v53 = vpop.f32.mrb[19].mxu0  ;;  %v490_v54 = vpop.f32.mrb[19].mxu1  ;;  %1975 = vmatpush1.bf16.msra.mxu1 %v4303_v38 }
 0x11d   :  { %v4318_v56 = vpack.c.bf16 %v564_v47, %v563_v46  ;;  %v535_v57 = vmax.f32 %v519_v43, %v520_v48  ;;  %v522_v58 = vmax.f32 %v312_v53, %v490_v54  ;;  %1976 = vmatprep.subr.bf16.mxu1 %v4310_v42 }
 0x11f   :  { %v553_v60 = vadd.f32 %v4246_v29, %v535_v57  ;;  %v536_v61 = vmax.f32 %v521_v52, %v522_v58  ;;  %1948 = vmatmul.mubr.bf16.gmra.mrb[56].mxu1 %v4318_v56 }
 0x120   :  { %1957 = vmatprep.mubr.bf16.mxu1 %v3802_v19  ;;  %1977 = vmatpush1.bf16.msra.mxu1 %v4316_v55 }
 0x121   :  { %v554_v63 = vadd.f32 %v4246_v29, %v536_v61  ;;  %v316_v0 = vpop.f32.mrb[20].mxu0  ;;  %v494_v1 = vpop.f32.mrb[20].mxu1  ;;  %1978 = vmatprep.subr.bf16.mxu1 %v4324_v59  ;;  %v565_v8 = vmax.f32 %v553_v60, 0.0 }
 0x122   :  { %v523_v3 = vmax.f32 %v316_v0, %v494_v1  ;;  %v318_v4 = vpop.f32.mrb[21].mxu0  ;;  %v496_v5 = vpop.f32.mrb[21].mxu1 }
 0x123   :  { %v566_v9 = vmax.f32 %v554_v63, 0.0  ;;  %v524_v11 = vmax.f32 %v318_v4, %v496_v5  ;;  %v320_v12 = vpop.f32.mrb[22].mxu0  ;;  %v498_v14 = vpop.f32.mrb[22].mxu1 }
 0x124   :  { %v525_v15 = vmax.f32 %v320_v12, %v498_v14  ;;  %v322_v16 = vpop.f32.mrb[23].mxu0  ;;  %v500_v18 = vpop.f32.mrb[23].mxu1  ;;  %1979 = vmatpush1.bf16.msra.mxu1 %v4333_v62  ;;  %v4381_v14 = vld [vmem:[%s4958_s3 + $0x100] ss:$8 sps:$4 sm:$0xff]  }
 0x125   :  { %v4348_v21 = vpack.c.bf16 %v566_v9, %v565_v8  ;;  %v537_v22 = vmax.f32 %v523_v3, %v524_v11  ;;  %v526_v23 = vmax.f32 %v322_v16, %v500_v18  ;;  %1980 = vmatprep.subr.bf16.mxu1 %v4340_v2 }
 0x127   :  { %v555_v25 = vadd.f32 %v4246_v29, %v537_v22  ;;  %v538_v26 = vmax.f32 %v525_v15, %v526_v23  ;;  %1958 = vmatmul.mubr.bf16.gmra.mrb[60].mxu1 %v4348_v21  ;;  %v4386_v22 = vld [vmem:[%s4958_s3 + $0x114] ss:$8 sps:$4 sm:$0xff]  }
 0x128   :  { %1981 = vmatpush1.bf16.msra.mxu1 %v4346_v20  ;;  %2000 = vmatprep.mubr.bf16.mxu1 %v3802_v19 }
 0x129   :  { %v556_v28 = vadd.f32 %v4246_v29, %v538_v26  ;;  %v694_v30 = vpop.f32.mrb[24].mxu0  ;;  %v872_v33 = vpop.f32.mrb[24].mxu1  ;;  %1982 = vmatprep.subr.bf16.mxu1 %v4354_v24  ;;  %v567_v40 = vmax.f32 %v555_v25, 0.0  ;;  %v4394_v26 = vld [vmem:[%s4958_s3 + $0x110] ss:$8 sps:$4 sm:$0xff]  }
 0x12a   :  { %v931_v36 = vmax.f32 %v694_v30, %v872_v33  ;;  %v696_v37 = vpop.f32.mrb[25].mxu0  ;;  %v874_v39 = vpop.f32.mrb[25].mxu1 }
 0x12b   :  { %v568_v41 = vmax.f32 %v556_v28, 0.0  ;;  %v932_v43 = vmax.f32 %v696_v37, %v874_v39  ;;  %v698_v44 = vpop.f32.mrb[26].mxu0  ;;  %v876_v45 = vpop.f32.mrb[26].mxu1 }
 0x12c   :  { %v933_v46 = vmax.f32 %v698_v44, %v876_v45  ;;  %v700_v47 = vpop.f32.mrb[27].mxu0  ;;  %v878_v48 = vpop.f32.mrb[27].mxu1  ;;  %1983 = vmatpush1.bf16.msra.mxu1 %v4362_v27 }
 0x12d   :  { %v955_v49 = vmax.f32 %v931_v36, %v932_v43  ;;  %v934_v50 = vmax.f32 %v700_v47, %v878_v48  ;;  %2041 = vmatprep.subr.bf16.mxu1 %v4370_v34  ;;  %v4374_v52 = vpack.c.bf16 %v568_v41, %v567_v40  ;;  %v4402_v36 = vld [vmem:[%s4958_s3 + $0x124] ss:$8 sps:$4 sm:$0xff]   ;;  %v4411_v48 = vld [vmem:[%s4958_s3 + $0x120] ss:$8 sps:$4 sm:$0xff]  }
 0x12f   :  { %v967_v53 = vadd.f32 %v4246_v29, %v955_v49  ;;  %v956_v54 = vmax.f32 %v933_v46, %v934_v50 }
 0x131   :  { %v968_v57 = vadd.f32 %v4246_v29, %v956_v54  ;;  %v704_v58 = vpop.f32.mrb[28].mxu0  ;;  %v882_v60 = vpop.f32.mrb[28].mxu1  ;;  %v979_v1 = vmax.f32 %v967_v53, 0.0  ;;  %v4420_v54 = vld [vmem:[%s4958_s3 + $0x134] ss:$8 sps:$4 sm:$0xff]  }
 0x132   :  { %v935_v61 = vmax.f32 %v704_v58, %v882_v60  ;;  %v706_v63 = vpop.f32.mrb[29].mxu0  ;;  %v884_v0 = vpop.f32.mrb[29].mxu1 }
 0x133   :  { %v980_v3 = vmax.f32 %v968_v57, 0.0  ;;  %v936_v4 = vmax.f32 %v706_v63, %v884_v0  ;;  %v708_v5 = vpop.f32.mrb[30].mxu0  ;;  %v886_v8 = vpop.f32.mrb[30].mxu1  ;;  %v4438_v63 = vld [vmem:[%s4958_s3 + $0x144] ss:$8 sps:$4 sm:$0xff]  }
 0x134   :  { %v937_v9 = vmax.f32 %v708_v5, %v886_v8  ;;  %v710_v11 = vpop.f32.mrb[31].mxu0  ;;  %v888_v12 = vpop.f32.mrb[31].mxu1 }
 0x135   :  { %v991_v15 = vpack.c.bf16 %v980_v3, %v979_v1  ;;  %v957_v16 = vmax.f32 %v935_v61, %v936_v4  ;;  %v938_v18 = vmax.f32 %v710_v11, %v888_v12 }
 0x137   :  { %v969_v23 = vadd.f32 %v4246_v29, %v957_v16  ;;  %v958_v25 = vmax.f32 %v937_v9, %v938_v18  ;;  %1144 = vmatmul.mubr.bf16.vlgmr.msra.gmra.mrb[48].mxu0 %v991_v15  ;;  %2001 = vmatmul.mubr.bf16.vlgmr.msra.gmra.mrb[48].mxu1 %v991_v15  ;;  %v4447_v15 = vld [vmem:[%s4958_s3 + $0x140] ss:$8 sps:$4 sm:$0xff]  }
 0x138   :  { %1265 = vmatpush1.bf16.msra.mxu0 %v4257_v6  ;;  %2042 = vmatpush1.bf16.msra.mxu1 %v4381_v14 }
 0x139   :  { %v970_v28 = vadd.f32 %v4246_v29, %v958_v25  ;;  %v714_v30 = vpop.f32.mrb[32].mxu0  ;;  %v892_v33 = vpop.f32.mrb[32].mxu1  ;;  %1266 = vmatprep.subr.bf16.mxu0 %v4264_v10  ;;  %2043 = vmatprep.subr.bf16.mxu1 %v4386_v22  ;;  %v981_v40 = vmax.f32 %v969_v23, 0.0  ;;  %v4456_v25 = vld [vmem:[%s4958_s3 + $0x154] ss:$8 sps:$4 sm:$0xff]  }
 0x13a   :  { %v939_v6 = vmax.f32 %v714_v30, %v892_v33  ;;  %v716_v37 = vpop.f32.mrb[33].mxu0  ;;  %v894_v39 = vpop.f32.mrb[33].mxu1  ;;  %1153 = vmatprep.mubr.bf16.mxu0 %v3802_v19  ;;  %2010 = vmatprep.mubr.bf16.mxu1 %v3802_v19  ;;  %v4474_v33 = vld [vmem:[%s4958_s3 + $0x164] ss:$8 sps:$4 sm:$0xff]  }
 0x13b   :  { %v982_v41 = vmax.f32 %v970_v28, 0.0  ;;  %v940_v43 = vmax.f32 %v716_v37, %v894_v39  ;;  %v718_v44 = vpop.f32.mrb[34].mxu0  ;;  %v896_v45 = vpop.f32.mrb[34].mxu1 }
 0x13c   :  { %v941_v10 = vmax.f32 %v718_v44, %v896_v45  ;;  %v720_v46 = vpop.f32.mrb[35].mxu0  ;;  %v898_v47 = vpop.f32.mrb[35].mxu1  ;;  %1267 = vmatpush1.bf16.msra.mxu0 %v4273_v13  ;;  %2044 = vmatpush1.bf16.msra.mxu1 %v4394_v26 }
 0x13d   :  { %v4413_v49 = vpack.c.bf16 %v982_v41, %v981_v40  ;;  %v959_v50 = vmax.f32 %v939_v6, %v940_v43  ;;  %v942_v53 = vmax.f32 %v720_v46, %v898_v47  ;;  %1268 = vmatprep.subr.bf16.mxu0 %v4280_v17  ;;  %2045 = vmatprep.subr.bf16.mxu1 %v4402_v36  ;;  %v4430_v17 = vld [vmem:[%s4958_s3 + $0x130] ss:$8 sps:$4 sm:$0xff]  }
 0x13f   :  { %v971_v13 = vadd.f32 %v4246_v29, %v959_v50  ;;  %v960_v57 = vmax.f32 %v941_v10, %v942_v53  ;;  %1154 = vmatmul.mubr.bf16.gmra.mrb[52].mxu0 %v4413_v49  ;;  %2011 = vmatmul.mubr.bf16.gmra.mrb[52].mxu1 %v4413_v49  ;;  %v4483_v10 = vld [vmem:[%s4958_s3 + $0x160] ss:$8 sps:$4 sm:$0xff]  }
 0x140   :  { %1269 = vmatpush1.bf16.msra.mxu0 %v4286_v31  ;;  %2046 = vmatpush1.bf16.msra.mxu1 %v4411_v48 }
 0x141   :  { %v972_v58 = vadd.f32 %v4246_v29, %v960_v57  ;;  %v724_v60 = vpop.f32.mrb[36].mxu0  ;;  %v902_v61 = vpop.f32.mrb[36].mxu1  ;;  %1270 = vmatprep.subr.bf16.mxu0 %v4294_v35  ;;  %2047 = vmatprep.subr.bf16.mxu1 %v4420_v54  ;;  %v983_v3 = vmax.f32 %v971_v13, 0.0 }
 0x142   :  { %v943_v31 = vmax.f32 %v724_v60, %v902_v61  ;;  %v726_v0 = vpop.f32.mrb[37].mxu0  ;;  %v904_v1 = vpop.f32.mrb[37].mxu1  ;;  %1163 = vmatprep.mubr.bf16.mxu0 %v3802_v19  ;;  %2020 = vmatprep.mubr.bf16.mxu1 %v3802_v19  ;;  %v4509_v61 = vld [vmem:[%s4958_s3 + $0x184] ss:$8 sps:$4 sm:$0xff]  }
 0x143   :  { %v984_v4 = vmax.f32 %v972_v58, 0.0  ;;  %v944_v5 = vmax.f32 %v726_v0, %v904_v1  ;;  %v728_v8 = vpop.f32.mrb[38].mxu0  ;;  %v906_v9 = vpop.f32.mrb[38].mxu1 }
 0x144   :  { %v945_v35 = vmax.f32 %v728_v8, %v906_v9  ;;  %v730_v11 = vpop.f32.mrb[39].mxu0  ;;  %v908_v12 = vpop.f32.mrb[39].mxu1  ;;  %1271 = vmatpush1.bf16.msra.mxu0 %v4303_v38  ;;  %2048 = vmatpush1.bf16.msra.mxu1 %v4430_v17 }
 0x145   :  { %v4449_v16 = vpack.c.bf16 %v984_v4, %v983_v3  ;;  %v961_v18 = vmax.f32 %v943_v31, %v944_v5  ;;  %v946_v23 = vmax.f32 %v730_v11, %v908_v12  ;;  %1272 = vmatprep.subr.bf16.mxu0 %v4310_v42  ;;  %2049 = vmatprep.subr.bf16.mxu1 %v4438_v63  ;;  %v4466_v42 = vld [vmem:[%s4958_s3 + $0x150] ss:$8 sps:$4 sm:$0xff]   ;;  %v4519_v11 = vld [vmem:[%s4958_s3 + $0x180] ss:$8 sps:$4 sm:$0xff]  }
 0x147   :  { %v973_v38 = vadd.f32 %v4246_v29, %v961_v18  ;;  %v962_v28 = vmax.f32 %v945_v35, %v946_v23  ;;  %1164 = vmatmul.mubr.bf16.gmra.mrb[56].mxu0 %v4449_v16  ;;  %2021 = vmatmul.mubr.bf16.gmra.mrb[56].mxu1 %v4449_v16 }
 0x148   :  { %1273 = vmatpush1.bf16.msra.mxu0 %v4316_v55  ;;  %2050 = vmatpush1.bf16.msra.mxu1 %v4447_v15 }
 0x149   :  { %v974_v30 = vadd.f32 %v4246_v29, %v962_v28  ;;  %1274 = vmatprep.subr.bf16.mxu0 %v4324_v59  ;;  %2051 = vmatprep.subr.bf16.mxu1 %v4456_v25  ;;  %v734_v6 = vpop.f32.mrb[40].mxu0  ;;  %v912_v55 = vpop.f32.mrb[40].mxu1  ;;  %v985_v41 = vmax.f32 %v973_v38, 0.0  ;;  %v4526_v38 = vld [vmem:[%s4958_s3 + $0x194] ss:$8 sps:$4 sm:$0xff]  }
 0x14a   :  { %1173 = vmatprep.mubr.bf16.mxu0 %v3802_v19  ;;  %2030 = vmatprep.mubr.bf16.mxu1 %v3802_v19  ;;  %v947_v37 = vmax.f32 %v734_v6, %v912_v55  ;;  %v736_v39 = vpop.f32.mrb[41].mxu0  ;;  %v914_v40 = vpop.f32.mrb[41].mxu1 }
 0x14b   :  { %v986_v43 = vmax.f32 %v974_v30, 0.0  ;;  %v948_v44 = vmax.f32 %v736_v39, %v914_v40  ;;  %v738_v59 = vpop.f32.mrb[42].mxu0  ;;  %v916_v45 = vpop.f32.mrb[42].mxu1 }
 0x14c   :  { %1275 = vmatpush1.bf16.msra.mxu0 %v4333_v62  ;;  %2052 = vmatpush1.bf16.msra.mxu1 %v4466_v42  ;;  %v949_v46 = vmax.f32 %v738_v59, %v916_v45  ;;  %v740_v47 = vpop.f32.mrb[43].mxu0  ;;  %v918_v50 = vpop.f32.mrb[43].mxu1  ;;  %v4492_v62 = vld [vmem:[%s4958_s3 + $0x174] ss:$8 sps:$4 sm:$0xff]   ;;  %v3742_v59 = vld [vmem:[%s4958_s3 + $0x224] ss:$8 sps:$4 sm:$0xff]  }
 0x14d   :  { %v4485_v53 = vpack.c.bf16 %v986_v43, %v985_v41  ;;  %1276 = vmatprep.subr.bf16.mxu0 %v4340_v2  ;;  %2053 = vmatprep.subr.bf16.mxu1 %v4474_v33  ;;  %v963_v13 = vmax.f32 %v947_v37, %v948_v44  ;;  %v950_v57 = vmax.f32 %v740_v47, %v918_v50  ;;  %v4502_v2 = vld [vmem:[%s4958_s3 + $0x170] ss:$8 sps:$4 sm:$0xff]   ;;  %v4653_v41 = vld [vmem:[%s4958_s3 + $0x200] ss:$8 sps:$4 sm:$0xff]   ;;  %v4660_v43 = vld [vmem:[%s4958_s3 + $0x214] ss:$8 sps:$4 sm:$0xff]  }
 0x14e   :  { %v3737_v44 = vld [vmem:[%s4958_s3 + $0x210] ss:$8 sps:$4 sm:$0xff]   ;;  %v3745_v45 = vld [vmem:[%s4958_s3 + $0x234] ss:$8 sps:$4 sm:$0xff]   ;;  %v3746_v47 = vld [vmem:[%s4958_s3 + $0x240] ss:$8 sps:$4 sm:$0xff]  }
 0x14f   :  { %1174 = vmatmul.mubr.bf16.gmra.mrb[60].mxu0 %v4485_v53  ;;  %2031 = vmatmul.mubr.bf16.gmra.mrb[60].mxu1 %v4485_v53  ;;  %v975_v58 = vadd.f32 %v4246_v29, %v963_v13  ;;  %v964_v60 = vmax.f32 %v949_v46, %v950_v57  ;;  %v3748_v46 = vld [vmem:[%s4958_s3 + $0x244] ss:$8 sps:$4 sm:$0xff]   ;;  %v3751_v50 = vld [vmem:[%s4958_s3 + $0x254] ss:$8 sps:$4 sm:$0xff]   ;;  %v3752_v57 = vld [vmem:[%s4958_s3 + $0x260] ss:$8 sps:$4 sm:$0xff]  }
 0x150   :  { %1277 = vmatpush1.bf16.msra.mxu0 %v4346_v20  ;;  %2054 = vmatpush1.bf16.msra.mxu1 %v4483_v10  ;;  %v3754_v13 = vld [vmem:[%s4958_s3 + $0x264] ss:$8 sps:$4 sm:$0xff]  }
 0x151   :  { %1278 = vmatprep.subr.bf16.mxu0 %v4354_v24  ;;  %2055 = vmatprep.subr.bf16.mxu1 %v4492_v62  ;;  %v987_v31 = vmax.f32 %v975_v58, 0.0  ;;  %v976_v0 = vadd.f32 %v4246_v29, %v964_v60  ;;  %v744_v20 = vpop.f32.mrb[44].mxu0  ;;  %v922_v1 = vpop.f32.mrb[44].mxu1  ;;  %v3757_v58 = vld [vmem:[%s4958_s3 + $0x274] ss:$8 sps:$4 sm:$0xff]  }
 0x152   :  { %1296 = vmatprep.mubr.bf16.mxu0 %v3802_v19  ;;  %2073 = vmatprep.mubr.bf16.mxu1 %v3802_v19  ;;  %v951_v3 = vmax.f32 %v744_v20, %v922_v1  ;;  %v746_v4 = vpop.f32.mrb[45].mxu0  ;;  %v924_v5 = vpop.f32.mrb[45].mxu1  ;;  %v3755_v60 = vld [vmem:[%s4958_s3 + $0x270] ss:$8 sps:$4 sm:$0xff]   ;;  %v3770_v1 = vld [vmem:[%s4960_s5 + $0x68] sm:$0xff]  }
 0x153   :  { %v988_v24 = vmax.f32 %v976_v0, 0.0  ;;  %v952_v8 = vmax.f32 %v746_v4, %v924_v5  ;;  %v748_v9 = vpop.f32.mrb[46].mxu0  ;;  %v926_v35 = vpop.f32.mrb[46].mxu1  ;;  %v3768_v0 = vld [vmem:[%s4960_s5 + $0x60] sm:$0xff]   ;;  %v3769_v20 = vld [vmem:[%s4960_s5 + $0x30] sm:$0xff]   ;;  %v3774_v5 = vld [vmem:[%s4960_s5 + $0x78] sm:$0xff]  }
 0x154   :  { %1279 = vmatpush1.bf16.msra.mxu0 %v4362_v27  ;;  %2056 = vmatpush1.bf16.msra.mxu1 %v4502_v2  ;;  %v953_v12 = vmax.f32 %v748_v9, %v926_v35  ;;  %v750_v18 = vpop.f32.mrb[47].mxu0  ;;  %v928_v23 = vpop.f32.mrb[47].mxu1  ;;  %v3772_v4 = vld [vmem:[%s4960_s5 + $0x70] sm:$0xff]  }
 0x155   :  { %1434 = vmatprep.subr.bf16.mxu0 %v4370_v34  ;;  %2130 = vmatprep.subr.bf16.mxu1 %v4509_v61  ;;  %v4528_v27 = vpack.c.bf16 %v988_v24, %v987_v31  ;;  %v965_v28 = vmax.f32 %v951_v3, %v952_v8  ;;  %v954_v30 = vmax.f32 %v750_v18, %v928_v23  ;;  %v4538_v34 = vld [vmem:[%s4958_s3 + $0x190] ss:$8 sps:$4 sm:$0xff]   ;;  %v3767_v31 = vld [vmem:[%s4960_s5 + $0x28] sm:$0xff]  }
 0x156   :  { %v3771_v3 = vld [vmem:[%s4960_s5 + $0x38] sm:$0xff]  }
 0x157   :  { %1297 = vmatmul.mubr.bf16.vlgmr.msra.gmra.mrb[48].mxu0 %v4250_v51  ;;  %2074 = vmatmul.mubr.bf16.vlgmr.msra.gmra.mrb[48].mxu1 %v4413_v49  ;;  %v977_v6 = vadd.f32 %v4246_v29, %v965_v28  ;;  %v966_v55 = vmax.f32 %v953_v12, %v954_v30  ;;  %v4545_v51 = vld [vmem:[%s4958_s3 + $0x1a4] ss:$8 sps:$4 sm:$0xff]  }
 0x158   :  { %1435 = vmatpush1.bf16.msra.mxu0 %v4381_v14  ;;  %2131 = vmatpush1.bf16.msra.mxu1 %v4519_v11 }
 0x159   :  { %1436 = vmatprep.subr.bf16.mxu0 %v4386_v22  ;;  %2132 = vmatprep.subr.bf16.mxu1 %v4526_v38  ;;  %v989_v37 = vmax.f32 %v977_v6, 0.0  ;;  %v978_v39 = vadd.f32 %v4246_v29, %v966_v55  ;;  %v4555_v22 = vld [vmem:[%s4958_s3 + $0x1a0] ss:$8 sps:$4 sm:$0xff]   ;;  %v4562_v29 = vld [vmem:[%s4958_s3 + $0x1b4] ss:$8 sps:$4 sm:$0xff]  }
 0x15a   :  { %1306 = vmatprep.mubr.bf16.mxu0 %v3802_v19  ;;  %2083 = vmatprep.mubr.bf16.mxu1 %v3802_v19 }
 0x15b   :  { %v990_v14 = vmax.f32 %v978_v39, 0.0 }
 0x15c   :  { %1437 = vmatpush1.bf16.msra.mxu0 %v4394_v26  ;;  %2133 = vmatpush1.bf16.msra.mxu1 %v4538_v34  ;;  %v4573_v26 = vld [vmem:[%s4958_s3 + $0x1b0] ss:$8 sps:$4 sm:$0xff]  }
 0x15d   :  { %1438 = vmatprep.subr.bf16.mxu0 %v4402_v36  ;;  %2134 = vmatprep.subr.bf16.mxu1 %v4545_v51  ;;  %v4564_v40 = vpack.c.bf16 %v990_v14, %v989_v37  ;;  %v4580_v36 = vld [vmem:[%s4958_s3 + $0x1c4] ss:$8 sps:$4 sm:$0xff]  }
 0x15f   :  { %1307 = vmatmul.mubr.bf16.gmra.mrb[52].mxu0 %v4259_v7  ;;  %2084 = vmatmul.mubr.bf16.gmra.mrb[52].mxu1 %v4449_v16 }
 0x160   :  { %1439 = vmatpush1.bf16.msra.mxu0 %v4411_v48  ;;  %2135 = vmatpush1.bf16.msra.mxu1 %v4555_v22  ;;  %v4589_v48 = vld [vmem:[%s4958_s3 + $0x1c0] ss:$8 sps:$4 sm:$0xff]  }
 0x161   :  { %1440 = vmatprep.subr.bf16.mxu0 %v4420_v54  ;;  %2136 = vmatprep.subr.bf16.mxu1 %v4562_v29  ;;  %v4596_v54 = vld [vmem:[%s4958_s3 + $0x1d4] ss:$8 sps:$4 sm:$0xff]  }
 0x162   :  { %1316 = vmatprep.mubr.bf16.mxu0 %v3802_v19  ;;  %2093 = vmatprep.mubr.bf16.mxu1 %v3802_v19 }
 0x164   :  { %1441 = vmatpush1.bf16.msra.mxu0 %v4430_v17  ;;  %2137 = vmatpush1.bf16.msra.mxu1 %v4573_v26  ;;  %v4605_v17 = vld [vmem:[%s4958_s3 + $0x1d0] ss:$8 sps:$4 sm:$0xff]  }
 0x165   :  { %1442 = vmatprep.subr.bf16.mxu0 %v4438_v63  ;;  %2138 = vmatprep.subr.bf16.mxu1 %v4580_v36  ;;  %v4612_v63 = vld [vmem:[%s4958_s3 + $0x1e4] ss:$8 sps:$4 sm:$0xff]  }
 0x167   :  { %1317 = vmatmul.mubr.bf16.gmra.mrb[56].mxu0 %v4288_v32  ;;  %2094 = vmatmul.mubr.bf16.gmra.mrb[56].mxu1 %v4485_v53 }
 0x168   :  { %1443 = vmatpush1.bf16.msra.mxu0 %v4447_v15  ;;  %2139 = vmatpush1.bf16.msra.mxu1 %v4589_v48  ;;  %v4621_v15 = vld [vmem:[%s4958_s3 + $0x1e0] ss:$8 sps:$4 sm:$0xff]  }
 0x169   :  { %1444 = vmatprep.subr.bf16.mxu0 %v4456_v25  ;;  %2140 = vmatprep.subr.bf16.mxu1 %v4596_v54  ;;  %v4628_v25 = vld [vmem:[%s4958_s3 + $0x1f4] ss:$8 sps:$4 sm:$0xff]  }
 0x16a   :  { %1326 = vmatprep.mubr.bf16.mxu0 %v3802_v19  ;;  %2103 = vmatprep.mubr.bf16.mxu1 %v3802_v19 }
 0x16c   :  { %1445 = vmatpush1.bf16.msra.mxu0 %v4466_v42  ;;  %2141 = vmatpush1.bf16.msra.mxu1 %v4605_v17  ;;  %v4637_v42 = vld [vmem:[%s4958_s3 + $0x1f0] ss:$8 sps:$4 sm:$0xff]  }
 0x16d   :  { %1446 = vmatprep.subr.bf16.mxu0 %v4474_v33  ;;  %2142 = vmatprep.subr.bf16.mxu1 %v4612_v63  ;;  %v4644_v33 = vld [vmem:[%s4958_s3 + $0x204] ss:$8 sps:$4 sm:$0xff]  }
 0x16f   :  { %1327 = vmatmul.mubr.bf16.gmra.mrb[60].mxu0 %v4318_v56  ;;  %2104 = vmatmul.mubr.bf16.gmra.mrb[60].mxu1 %v4528_v27 }
 0x170   :  { %1447 = vmatpush1.bf16.msra.mxu0 %v4483_v10  ;;  %2143 = vmatpush1.bf16.msra.mxu1 %v4621_v15  ;;  %v3743_v10 = vld [vmem:[%s4958_s3 + $0x230] ss:$8 sps:$4 sm:$0xff]  }
 0x171   :  { %1448 = vmatprep.subr.bf16.mxu0 %v4492_v62  ;;  %2144 = vmatprep.subr.bf16.mxu1 %v4628_v25  ;;  %v3749_v62 = vld [vmem:[%s4958_s3 + $0x250] ss:$8 sps:$4 sm:$0xff]  }
 0x172   :  { %1466 = vmatprep.mubr.bf16.mxu0 %v3802_v19  ;;  %2162 = vmatprep.mubr.bf16.mxu1 %v3802_v19 }
 0x174   :  { %1449 = vmatpush1.bf16.msra.mxu0 %v4502_v2  ;;  %2145 = vmatpush1.bf16.msra.mxu1 %v4637_v42  ;;  %v3765_v2 = vld [vmem:[%s4960_s5 + $0x20] sm:$0xff]  }
 0x175   :  { %1620 = vmatprep.subr.bf16.mxu0 %v4509_v61  ;;  %2219 = vmatprep.subr.bf16.mxu1 %v4644_v33  ;;  %v3766_v61 = vld [vmem:[%s4960_s5 + $0x58] sm:$0xff]  }
 0x177   :  { %1467 = vmatmul.mubr.bf16.vlgmr.msra.gmra.mrb[48].mxu0 %v4259_v7  ;;  %2163 = vmatmul.mubr.bf16.vlgmr.msra.gmra.mrb[48].mxu1 %v4288_v32  ;;  %v3740_v7 = vld [vmem:[%s4958_s3 + $0x220] ss:$8 sps:$4 sm:$0xff]  }
 0x178   :  { %1621 = vmatpush1.bf16.msra.mxu0 %v4519_v11  ;;  %2220 = vmatpush1.bf16.msra.mxu1 %v4653_v41 }
 0x179   :  { %1622 = vmatprep.subr.bf16.mxu0 %v4526_v38  ;;  %2221 = vmatprep.subr.bf16.mxu1 %v4660_v43 }
 0x17a   :  { %1476 = vmatprep.mubr.bf16.mxu0 %v3802_v19  ;;  %2172 = vmatprep.mubr.bf16.mxu1 %v3802_v19 }
 0x17c   :  { %1623 = vmatpush1.bf16.msra.mxu0 %v4538_v34  ;;  %2222 = vmatpush1.bf16.msra.mxu1 %v3737_v44 }
 0x17d   :  { %1624 = vmatprep.subr.bf16.mxu0 %v4545_v51  ;;  %2223 = vmatprep.subr.bf16.mxu1 %v3742_v59 }
 0x17f   :  { %1477 = vmatmul.mubr.bf16.gmra.mrb[52].mxu0 %v4288_v32  ;;  %2173 = vmatmul.mubr.bf16.gmra.mrb[52].mxu1 %v4318_v56 }
 0x180   :  { %1625 = vmatpush1.bf16.msra.mxu0 %v4555_v22  ;;  %2224 = vmatpush1.bf16.msra.mxu1 %v3740_v7 }
 0x181   :  { %1626 = vmatprep.subr.bf16.mxu0 %v4562_v29  ;;  %2225 = vmatprep.subr.bf16.mxu1 %v3745_v45 }
 0x182   :  { %1486 = vmatprep.mubr.bf16.mxu0 %v3802_v19  ;;  %2182 = vmatprep.mubr.bf16.mxu1 %v3802_v19 }
 0x184   :  { %1627 = vmatpush1.bf16.msra.mxu0 %v4573_v26  ;;  %2226 = vmatpush1.bf16.msra.mxu1 %v3743_v10 }
 0x185   :  { %1628 = vmatprep.subr.bf16.mxu0 %v4580_v36  ;;  %2227 = vmatprep.subr.bf16.mxu1 %v3748_v46 }
 0x187   :  { %1487 = vmatmul.mubr.bf16.gmra.mrb[56].mxu0 %v4318_v56  ;;  %2183 = vmatmul.mubr.bf16.gmra.mrb[56].mxu1 %v4348_v21 }
 0x188   :  { %1629 = vmatpush1.bf16.msra.mxu0 %v4589_v48  ;;  %2228 = vmatpush1.bf16.msra.mxu1 %v3746_v47 }
 0x189   :  { %1630 = vmatprep.subr.bf16.mxu0 %v4596_v54  ;;  %2229 = vmatprep.subr.bf16.mxu1 %v3751_v50 }
 0x18a   :  { %1496 = vmatprep.mubr.bf16.mxu0 %v3802_v19  ;;  %2192 = vmatprep.mubr.bf16.mxu1 %v3802_v19 }
 0x18c   :  { %1631 = vmatpush1.bf16.msra.mxu0 %v4605_v17  ;;  %2230 = vmatpush1.bf16.msra.mxu1 %v3749_v62 }
 0x18d   :  { %1632 = vmatprep.subr.bf16.mxu0 %v4612_v63  ;;  %2231 = vmatprep.subr.bf16.mxu1 %v3754_v13 }
 0x18f   :  { %1497 = vmatmul.mubr.bf16.gmra.mrb[60].mxu0 %v4348_v21  ;;  %2193 = vmatmul.mubr.bf16.gmra.mrb[60].mxu1 %v4374_v52 }
 0x190   :  { %1633 = vmatpush1.bf16.msra.mxu0 %v4621_v15  ;;  %2232 = vmatpush1.bf16.msra.mxu1 %v3752_v57 }
 0x191   :  { %1634 = vmatprep.subr.bf16.mxu0 %v4628_v25  ;;  %2233 = vmatprep.subr.bf16.mxu1 %v3757_v58 }
 0x192   :  { %1652 = vmatprep.mubr.bf16.mxu0 %v3802_v19  ;;  %2251 = vmatprep.mubr.bf16.mxu1 %v3802_v19 }
 0x194   :  { %1635 = vmatpush1.bf16.msra.mxu0 %v4637_v42  ;;  %2234 = vmatpush1.bf16.msra.mxu1 %v3755_v60 }
 0x195   :  { %1806 = vmatprep.subr.bf16.mxu0 %v4644_v33 }
 0x197   :  { %1653 = vmatmul.mubr.bf16.vlgmr.msra.gmra.mrb[48].mxu0 %v4413_v49  ;;  %2252 = vmatmul.mubr.bf16.vlgmr.msra.gmra.mrb[48].mxu1 %v4449_v16  ;;  %v3803_v49 = vmov 0.0  }
 0x198   :  { %1807 = vmatpush1.bf16.msra.mxu0 %v4653_v41  ;;  %1662 = vmatprep.mubr.bf16.mxu0 %v3802_v19 }
 0x199   :  { %1808 = vmatprep.subr.bf16.mxu0 %v4660_v43  ;;  %2261 = vmatprep.mubr.bf16.mxu1 %v3802_v19 }
 0x19a   :  { %3336 = vmatprep.subr.bf16.mxu1 %v3803_v49 }
 0x19c   :  { %1809 = vmatpush1.bf16.msra.mxu0 %v3737_v44 }
 0x19d   :  { %1810 = vmatprep.subr.bf16.mxu0 %v3742_v59 }
 0x19f   :  { %1663 = vmatmul.mubr.bf16.gmra.mrb[52].mxu0 %v4449_v16  ;;  %2262 = vmatmul.mubr.bf16.gmra.mrb[52].mxu1 %v4485_v53  ;;  %v3758_v16 = vld [vmem:[%s4960_s5] sm:$0xff]  }
 0x1a0   :  { %1811 = vmatpush1.bf16.msra.mxu0 %v3740_v7  ;;  %1672 = vmatprep.mubr.bf16.mxu0 %v3802_v19 }
 0x1a1   :  { %1812 = vmatprep.subr.bf16.mxu0 %v3745_v45  ;;  %2271 = vmatprep.mubr.bf16.mxu1 %v3802_v19 }
 0x1a2   :  { %3337 = vmatpush3.bf16.msra.mxu1 %v3758_v16 }
 0x1a3   :  { %3338 = vmatprep.subr.bf16.mxu1 %v3803_v49 }
 0x1a4   :  { %1813 = vmatpush1.bf16.msra.mxu0 %v3743_v10  ;;  %v3773_v10 = vld [vmem:[%s4960_s5 + $0xc0] sm:$0xff]  }
 0x1a5   :  { %1814 = vmatprep.subr.bf16.mxu0 %v3748_v46 }
 0x1a7   :  { %1673 = vmatmul.mubr.bf16.gmra.mrb[56].mxu0 %v4485_v53  ;;  %2272 = vmatmul.mubr.bf16.gmra.mrb[56].mxu1 %v4528_v27  ;;  %v3764_v53 = vld [vmem:[%s4960_s5 + $0x50] sm:$0xff]  }
 0x1a8   :  { %1815 = vmatpush1.bf16.msra.mxu0 %v3746_v47  ;;  %1682 = vmatprep.mubr.bf16.mxu0 %v3802_v19 }
 0x1a9   :  { %1816 = vmatprep.subr.bf16.mxu0 %v3751_v50  ;;  %2281 = vmatprep.mubr.bf16.mxu1 %v3802_v19 }
 0x1ac   :  { %1817 = vmatpush1.bf16.msra.mxu0 %v3749_v62 }
 0x1ad   :  { %1818 = vmatprep.subr.bf16.mxu0 %v3754_v13 }
 0x1af   :  { %1683 = vmatmul.mubr.bf16.gmra.mrb[60].mxu0 %v4528_v27  ;;  %2282 = vmatmul.mubr.bf16.gmra.mrb[60].mxu1 %v4564_v40  ;;  %v4840_v40 = vld [vmem:[%s4961_s4] ss:$0 sm:$0xff] }
 0x1b0   :  { %1819 = vmatpush1.bf16.msra.mxu0 %v3752_v57  ;;  %1838 = vmatprep.mubr.bf16.mxu0 %v3802_v19  ;;  %v3775_v57 = vld [vmem:[%s4960_s5 + $0xc8] sm:$0xff]  }
 0x1b1   :  { %1820 = vmatprep.subr.bf16.mxu0 %v3757_v58  ;;  %3352 = vmatprep.mubr.msk.bf16.mxu1 %vm3804_vm2, %v3803_v49 }
 0x1b4   :  { %1821 = vmatpush1.bf16.msra.mxu0 %v3755_v60 }
 0x1b5   :  { %3316 = vmatprep.subr.bf16.mxu0 %v3803_v49 }
 0x1b7   :  { %1839 = vmatmul.mubr.bf16.vlgmr.msra.gmra.mrb[48].mxu0 %v4288_v32  ;;  %v3759_v32 = vld [vmem:[%s4960_s5 + $0x8] sm:$0xff]  }
 0x1b8   :  { %1848 = vmatprep.mubr.bf16.mxu0 %v3802_v19  ;;  %3339 = vmatpush3.bf16.msra.mxu1 %v3759_v32 }
 0x1b9   :  { %3340 = vmatprep.subr.bf16.mxu1 %v3803_v49 }
 0x1bf   :  { %1849 = vmatmul.mubr.bf16.gmra.mrb[52].mxu0 %v4318_v56  ;;  %v3761_v56 = vld [vmem:[%s4960_s5 + $0x10] sm:$0xff]  }
 0x1c0   :  { %1858 = vmatprep.mubr.bf16.mxu0 %v3802_v19  ;;  %3341 = vmatpush3.bf16.msra.mxu1 %v3761_v56 }
 0x1c1   :  { %3342 = vmatprep.subr.bf16.mxu1 %v3803_v49 }
 0x1c7   :  { %1859 = vmatmul.mubr.bf16.gmra.mrb[56].mxu0 %v4348_v21  ;;  %v3762_v21 = vld [vmem:[%s4960_s5 + $0x48] sm:$0xff]  }
 0x1c8   :  { %1868 = vmatprep.mubr.bf16.mxu0 %v3802_v19  ;;  %v3760_v19 = vld [vmem:[%s4960_s5 + $0x40] sm:$0xff]  }
 0x1c9   :  { %3317 = vmatpush3.bf16.msra.mxu0 %v3760_v19 }
 0x1ca   :  { %3318 = vmatprep.subr.bf16.mxu0 %v3803_v49 }
 0x1cd   :  { %3319 = vmatpush3.bf16.msra.mxu0 %v3762_v21 }
 0x1ce   :  { %3320 = vmatprep.subr.bf16.mxu0 %v3803_v49 }
 0x1cf   :  { %1869 = vmatmul.mubr.bf16.gmra.mrb[60].mxu0 %v4374_v52  ;;  %v3763_v52 = vld [vmem:[%s4960_s5 + $0x18] sm:$0xff]  }
 0x1d0   :  { %3343 = vmatpush3.bf16.msra.mxu1 %v3763_v52  ;;  %3332 = vmatprep.mubr.msk.bf16.mxu0 %vm3804_vm2, %v3803_v49 }
 0x1d1   :  { %3344 = vmatprep.subr.bf16.mxu1 %v3803_v49  ;;  %3321 = vmatpush3.bf16.msra.mxu0 %v3764_v53 }
 0x1d2   :  { %3322 = vmatprep.subr.bf16.mxu0 %v3803_v49 }
 0x1d4   :  { %3345 = vmatpush3.bf16.msra.mxu1 %v3765_v2 }
 0x1d5   :  { %3346 = vmatprep.subr.bf16.mxu1 %v3803_v49  ;;  %3323 = vmatpush3.bf16.msra.mxu0 %v3766_v61  ;;  %v3776_v61 = vld [vmem:[%s4960_s5 + $0x80] sm:$0xff]  }
 0x1d6   :  { %3324 = vmatprep.subr.bf16.mxu0 %v3803_v49 }
 0x1d8   :  { %3347 = vmatpush3.bf16.msra.mxu1 %v3767_v31  ;;  %v3777_v31 = vld [vmem:[%s4960_s5 + $0xd0] sm:$0xff]  }
 0x1d9   :  { %3348 = vmatprep.subr.bf16.mxu1 %v3803_v49  ;;  %3325 = vmatpush3.bf16.msra.mxu0 %v3768_v0 }
 0x1da   :  { %3326 = vmatprep.subr.bf16.mxu0 %v3803_v49 }
 0x1dc   :  { %3349 = vmatpush3.bf16.msra.mxu1 %v3769_v20 }
 0x1dd   :  { %3350 = vmatprep.subr.bf16.mxu1 %v3803_v49  ;;  %3327 = vmatpush3.bf16.msra.mxu0 %v3770_v1 }
 0x1de   :  { %3328 = vmatprep.subr.bf16.mxu0 %v3803_v49 }
 0x1e0   :  { %3351 = vmatpush3.bf16.msra.mxu1 %v3771_v3 }
 0x1e1   :  { %3376 = vmatprep.subr.bf16.mxu1 %v3803_v49  ;;  %3329 = vmatpush3.bf16.msra.mxu0 %v3772_v4 }
 0x1e2   :  { %3330 = vmatprep.subr.bf16.mxu0 %v3803_v49 }
 0x1e5   :  { %3331 = vmatpush3.bf16.msra.mxu0 %v3774_v5  ;;  %v3778_v5 = vld [vmem:[%s4960_s5 + $0x88] sm:$0xff]  }
 0x1e6   :  { %3356 = vmatprep.subr.bf16.mxu0 %v3803_v49 }
 0x26a   :  { %v2253_v24 = vpop.f32.mrb[48].mxu1 }
 0x26b   :  { %v2255_v8 = vpop.f32.mrb[49].mxu1 }
 0x26c   :  { %v2257_v9 = vpop.f32.mrb[50].mxu1 }
 0x26d   :  { %v2259_v35 = vpop.f32.mrb[51].mxu1 }
 0x272   :  { %v2263_v11 = vpop.f32.mrb[52].mxu1 }
 0x273   :  { %v2265_v12 = vpop.f32.mrb[53].mxu1 }
 0x274   :  { %v2267_v18 = vpop.f32.mrb[54].mxu1 }
 0x275   :  { %v2269_v23 = vpop.f32.mrb[55].mxu1 }
 0x27a   :  { %v2273_v38 = vpop.f32.mrb[56].mxu1 }
 0x27b   :  { %v2275_v27 = vpop.f32.mrb[57].mxu1 }
 0x27c   :  { %v2277_v28 = vpop.f32.mrb[58].mxu1 }
 0x27d   :  { %v2279_v30 = vpop.f32.mrb[59].mxu1 }
 0x282   :  { %v4829_v6 = vpop.f32.mrb[60].mxu1 }
 0x283   :  { %v4831_v55 = vpop.f32.mrb[61].mxu1 }
 0x284   :  { %v4833_v34 = vpop.f32.mrb[62].mxu1 }
 0x285   :  { %v4835_v51 = vpop.f32.mrb[63].mxu1 }
 0x28a   :  { %v1840_v37 = vpop.f32.mrb[48].mxu0 }
 0x28b   :  { %v2308_v39 = vmax.f32 %v1840_v37, %v2253_v24  ;;  %v1842_v14 = vpop.f32.mrb[49].mxu0  ;;  %v3779_v24 = vld [vmem:[%s4960_s5 + $0xd8] sm:$0xff]  }
 0x28c   :  { %v2309_v22 = vmax.f32 %v1842_v14, %v2255_v8  ;;  %v1844_v29 = vpop.f32.mrb[50].mxu0 }
 0x28d   :  { %v2310_v26 = vmax.f32 %v1844_v29, %v2257_v9  ;;  %v1846_v36 = vpop.f32.mrb[51].mxu0  ;;  %v3783_v29 = vld [vmem:[%s4960_s5 + $0xe8] sm:$0xff]  }
 0x28e   :  { %v2324_v48 = vmax.f32 %v2308_v39, %v2309_v22  ;;  %v2311_v54 = vmax.f32 %v1846_v36, %v2259_v35  ;;  %v3782_v22 = vld [vmem:[%s4960_s5 + $0x98] sm:$0xff]  }
 0x290   :  { %v2338_v17 = vadd.f32 %v4840_v40, %v2324_v48  ;;  %v2325_v63 = vmax.f32 %v2310_v26, %v2311_v54  ;;  %v3784_v48 = vld [vmem:[%s4960_s5 + $0xa0] sm:$0xff]   ;;  %v3785_v54 = vld [vmem:[%s4960_s5 + $0xf0] sm:$0xff]  }
 0x292   :  { %v2339_v15 = vadd.f32 %v4840_v40, %v2325_v63  ;;  %v1850_v25 = vpop.f32.mrb[52].mxu0  ;;  %v2346_v41 = vmax.f32 %v2338_v17, 0.0  ;;  %v3787_v63 = vld [vmem:[%s4960_s5 + $0xf8] sm:$0xff]  }
 0x293   :  { %v2312_v42 = vmax.f32 %v1850_v25, %v2263_v11  ;;  %v1852_v33 = vpop.f32.mrb[53].mxu0  ;;  %v3789_v25 = vld [vmem:[%s4960_s5 + $0xb8] sm:$0xff]  }
 0x294   :  { %v2347_v43 = vmax.f32 %v2339_v15, 0.0  ;;  %v2313_v44 = vmax.f32 %v1852_v33, %v2265_v12  ;;  %v1854_v59 = vpop.f32.mrb[54].mxu0  ;;  %v3788_v15 = vld [vmem:[%s4960_s5 + $0xb0] sm:$0xff]   ;;  %v3791_v33 = vld [vmem:[%s4962_s7 + $0x8] sm:$0xff]  }
 0x295   :  { %v2314_v7 = vmax.f32 %v1854_v59, %v2267_v18  ;;  %v1856_v45 = vpop.f32.mrb[55].mxu0 }
 0x296   :  { %v2354_v46 = vpack.c.bf16 %v2347_v43, %v2346_v41  ;;  %v2326_v47 = vmax.f32 %v2312_v42, %v2313_v44  ;;  %v2315_v50 = vmax.f32 %v1856_v45, %v2269_v23  ;;  %v3790_v42 = vld [vmem:[%s4962_s7] sm:$0xff]   ;;  %v3792_v41 = vld [vmem:[%s4962_s7 + $0x10] sm:$0xff]   ;;  %v3793_v43 = vld [vmem:[%s4962_s7 + $0x18] sm:$0xff]  }
 0x298   :  { %v2340_v62 = vadd.f32 %v4840_v40, %v2326_v47  ;;  %v2327_v13 = vmax.f32 %v2314_v7, %v2315_v50  ;;  %3353 = vmatmul.mubr.bf16.vlgmr.msra.gmra.mrb[64].mxu1 %v2354_v46 }
 0x299   :  { %3377 = vmatpush3.bf16.msra.mxu1 %v3773_v10  ;;  %3392 = vmatprep.mubr.msk.bf16.mxu1 %vm3804_vm2, %v3803_v49 }
 0x29a   :  { %v2341_v58 = vadd.f32 %v4840_v40, %v2327_v13  ;;  %v1860_v60 = vpop.f32.mrb[56].mxu0  ;;  %3378 = vmatprep.subr.bf16.mxu1 %v3803_v49  ;;  %v2348_v19 = vmax.f32 %v2340_v62, 0.0 }
 0x29b   :  { %v2316_v16 = vmax.f32 %v1860_v60, %v2273_v38  ;;  %v1862_v32 = vpop.f32.mrb[57].mxu0 }
 0x29c   :  { %v2349_v56 = vmax.f32 %v2341_v58, 0.0  ;;  %v2317_v21 = vmax.f32 %v1862_v32, %v2275_v27  ;;  %v1864_v52 = vpop.f32.mrb[58].mxu0 }
 0x29d   :  { %v2318_v53 = vmax.f32 %v1864_v52, %v2277_v28  ;;  %3379 = vmatpush3.bf16.msra.mxu1 %v3775_v57  ;;  %v1866_v2 = vpop.f32.mrb[59].mxu0 }
 0x29e   :  { %v2355_v0 = vpack.c.bf16 %v2349_v56, %v2348_v19  ;;  %v2328_v20 = vmax.f32 %v2316_v16, %v2317_v21  ;;  %v2319_v1 = vmax.f32 %v1866_v2, %v2279_v30  ;;  %3380 = vmatprep.subr.bf16.mxu1 %v3803_v49  ;;  %v3780_v30 = vld [vmem:[%s4960_s5 + $0x90] sm:$0xff]   ;;  %v3268_v56 = vld [vmem:[%s4963_s6] ss:$0 sm:$0xff] }
 0x2a0   :  { %v2342_v3 = vadd.f32 %v4840_v40, %v2328_v20  ;;  %v2329_v4 = vmax.f32 %v2318_v53, %v2319_v1  ;;  %3333 = vmatmul.mubr.bf16.vlgmr.msra.gmra.mrb[64].mxu0 %v2355_v0 }
 0x2a1   :  { %3357 = vmatpush3.bf16.msra.mxu0 %v3776_v61  ;;  %3381 = vmatpush3.bf16.msra.mxu1 %v3777_v31 }
 0x2a2   :  { %v2343_v8 = vadd.f32 %v4840_v40, %v2329_v4  ;;  %v1870_v9 = vpop.f32.mrb[60].mxu0  ;;  %3358 = vmatprep.subr.bf16.mxu0 %v3803_v49  ;;  %3382 = vmatprep.subr.bf16.mxu1 %v3803_v49  ;;  %v2350_v12 = vmax.f32 %v2342_v3, 0.0  ;;  %v3269_v4 = vld [vmem:[%s4964_s8] ss:$0 sm:$0xff] }
 0x2a3   :  { %v2320_v35 = vmax.f32 %v1870_v9, %v4829_v6  ;;  %v1872_v11 = vpop.f32.mrb[61].mxu0  ;;  %3372 = vmatprep.mubr.msk.bf16.mxu0 %vm3804_vm2, %v3803_v49  ;;  %v3781_v6 = vld [vmem:[%s4960_s5 + $0xe0] sm:$0xff]  }
 0x2a4   :  { %v2351_v18 = vmax.f32 %v2343_v8, 0.0  ;;  %v2321_v23 = vmax.f32 %v1872_v11, %v4831_v55  ;;  %v1874_v38 = vpop.f32.mrb[62].mxu0 }
 0x2a5   :  { %v2322_v27 = vmax.f32 %v1874_v38, %v4833_v34  ;;  %3359 = vmatpush3.bf16.msra.mxu0 %v3778_v5  ;;  %3383 = vmatpush3.bf16.msra.mxu1 %v3779_v24  ;;  %v1876_v28 = vpop.f32.mrb[63].mxu0 }
 0x2a6   :  { %v2356_v37 = vpack.c.bf16 %v2351_v18, %v2350_v12  ;;  %v2330_v39 = vmax.f32 %v2320_v35, %v2321_v23  ;;  %v2323_v14 = vmax.f32 %v1876_v28, %v4835_v51  ;;  %3360 = vmatprep.subr.bf16.mxu0 %v3803_v49  ;;  %3384 = vmatprep.subr.bf16.mxu1 %v3803_v49 }
 0x2a8   :  { %v2344_v55 = vadd.f32 %v4840_v40, %v2330_v39  ;;  %v2331_v34 = vmax.f32 %v2322_v27, %v2323_v14 }
 0x2a9   :  { %3361 = vmatpush3.bf16.msra.mxu0 %v3780_v30  ;;  %3385 = vmatpush3.bf16.msra.mxu1 %v3781_v6 }
 0x2aa   :  { %v2345_v26 = vadd.f32 %v4840_v40, %v2331_v34  ;;  %3362 = vmatprep.subr.bf16.mxu0 %v3803_v49  ;;  %3386 = vmatprep.subr.bf16.mxu1 %v3803_v49  ;;  %v2352_v51 = vmax.f32 %v2344_v55, 0.0  ;;  %v3786_v40 = vld [vmem:[%s4960_s5 + $0xa8] sm:$0xff]  }
 0x2ac   :  { %v2353_v36 = vmax.f32 %v2345_v26, 0.0 }
 0x2ad   :  { %3363 = vmatpush3.bf16.msra.mxu0 %v3782_v22  ;;  %3387 = vmatpush3.bf16.msra.mxu1 %v3783_v29 }
 0x2ae   :  { %v2357_v17 = vpack.c.bf16 %v2353_v36, %v2352_v51  ;;  %3364 = vmatprep.subr.bf16.mxu0 %v3803_v49  ;;  %3388 = vmatprep.subr.bf16.mxu1 %v3803_v49 }
 0x2b1   :  { %3365 = vmatpush3.bf16.msra.mxu0 %v3784_v48  ;;  %3389 = vmatpush3.bf16.msra.mxu1 %v3785_v54 }
 0x2b2   :  { %3366 = vmatprep.subr.bf16.mxu0 %v3803_v49  ;;  %3390 = vmatprep.subr.bf16.mxu1 %v3803_v49 }
 0x2b5   :  { %3367 = vmatpush3.bf16.msra.mxu0 %v3786_v40  ;;  %3391 = vmatpush3.bf16.msra.mxu1 %v3787_v63 }
 0x2b6   :  { %3368 = vmatprep.subr.bf16.mxu0 %v3803_v49 }
 0x2b8   :  { %3393 = vmatmul.mubr.bf16.vlgmr.msra.gmra.mrb[68].mxu1 %v2357_v17 }
 0x2b9   :  { %3369 = vmatpush3.bf16.msra.mxu0 %v3788_v15 }
 0x2ba   :  { %3370 = vmatprep.subr.bf16.mxu0 %v3803_v49 }
 0x2bd   :  { %3371 = vmatpush3.bf16.msra.mxu0 %v3789_v25 }
 0x2be   :  { %3396 = vmatprep.subr.bf16.mxu0 %v3803_v49 }
 0x2c0   :  { %3373 = vmatmul.mubr.bf16.vlgmr.msra.gmra.mrb[68].mxu0 %v2356_v37 }
 0x2c1   :  { %3404 = vmatprep.mubr.msk.bf16.mxu0 %vm3804_vm2, %v3803_v49  ;;  %3397 = vmatpush3.bf16.msra.mxu0 %v3790_v42 }
 0x2c2   :  { %3398 = vmatprep.subr.bf16.mxu0 %v3803_v49 }
 0x2c5   :  { %3399 = vmatpush3.bf16.msra.mxu0 %v3791_v33 }
 0x2c6   :  { %3400 = vmatprep.subr.bf16.mxu0 %v3803_v49 }
 0x2c9   :  { %3401 = vmatpush3.bf16.msra.mxu0 %v3792_v41 }
 0x2ca   :  { %3402 = vmatprep.subr.bf16.mxu0 %v3803_v49 }
 0x2cd   :  { %3403 = vmatpush3.bf16.msra.mxu0 %v3793_v43 }
 0x36b   :  { %v2562_v44 = vpop.f32.mrb[64].mxu1 }
 0x36c   :  { %v3354_v59 = vpop.f32.mrb[65].mxu1 }
 0x36d   :  { %v2565_v7 = vpop.f32.mrb[66].mxu1 }
 0x36e   :  { %v3355_v45 = vpop.f32.mrb[67].mxu1 }
 0x373   :  { %v2473_v10 = vpop.f32.mrb[64].mxu0 }
 0x374   :  { %v2563_v46 = vadd.f32 %v2562_v44, %v2473_v10  ;;  %v3334_v47 = vpop.f32.mrb[65].mxu0 }
 0x375   :  { %v2476_v50 = vpop.f32.mrb[66].mxu0 }
 0x376   :  { %v2566_v62 = vadd.f32 %v2565_v7, %v2476_v50  ;;  %v3335_v13 = vpop.f32.mrb[67].mxu0 }
 0x38b   :  { %v2776_v57 = vpop.f32.mrb[68].mxu1 }
 0x38c   :  { %v3394_v58 = vpop.f32.mrb[69].mxu1 }
 0x38d   :  { %v2779_v60 = vpop.f32.mrb[70].mxu1 }
 0x38e   :  { %v3395_v16 = vpop.f32.mrb[71].mxu1 }
 0x393   :  { %v2668_v49 = vpop.f32.mrb[68].mxu0 }
 0x394   :  { %v2675_v32 = vadd.f32 %v2668_v49, %v2563_v46  ;;  %v3374_v19 = vpop.f32.mrb[69].mxu0 }
 0x395   :  { %v2671_v21 = vpop.f32.mrb[70].mxu0 }
 0x396   :  { %v2783_v52 = vadd.f32 %v2776_v57, %v2675_v32  ;;  %v2676_v53 = vadd.f32 %v2671_v21, %v2566_v62  ;;  %v3375_v2 = vpop.f32.mrb[71].mxu0 }
 0x398   :  { %v2792_v61 = vadd.f32 %v3268_v56, %v2783_v52  ;;  %v2784_v31 = vadd.f32 %v2779_v60, %v2676_v53 }
 0x39a   :  { %v2793_v0 = vadd.f32 %v3268_v56, %v2784_v31  ;;  %v2794_v20 = vmax.f32 %v2792_v61, 0.0 }
 0x39c   :  { %v2795_v1 = vmax.f32 %v2793_v0, 0.0 }
 0x39e   :  { %v2796_v3 = vpack.c.bf16 %v2795_v1, %v2794_v20 }
 0x3a0   :  { %3405 = vmatmul.mubr.msk.bf16.vlgmr.msra.gmra.mrb[72].mxu0 %vm2836_vm3, %v2796_v3 }
 0x473   :  { %v2874_v5 = vpop.f32.mrb[72].mxu0 }
 0x474   :  { %v2875_v24 = vadd.f32 %v3269_v4, %v2874_v5  ;;  %v3406_v8 = vpop.f32.mrb[73].mxu0 }
 0x475   :  { %v2877_v9 = vpop.f32.mrb[74].mxu0 }
 0x476   :  { %v2878_v35 = vadd.f32 %v3269_v4, %v2877_v9  ;;  %v3407_v11 = vpop.f32.mrb[75].mxu0  ;;  %v2882_v12 = vsel %vm2881_vm4, %v2875_v24, -inf }
 0x477   :  { %2883 = vmax.xlane.f32.xlu0 %v2882_v12 }
 0x478   :  { %v2885_v18 = vsel %vm2881_vm4, %v2878_v35, -inf }
 0x47b   :  { %2886 = vmax.xlane.f32.xlu0 %v2885_v18 }
 0x504   :  { %v2884_v23 = vpop.xlane.xlu0 %2883 }
 0x505   :  { %v2888_v38 = vsub.f32 %v2875_v24, %v2884_v23 }
 0x507   :  { %v2890_v27 = vmul.f32 1.442695, %v2888_v38 }
 0x508   :  { %v2887_v28 = vpop.xlane.xlu0 %2886 }
 0x509   :  { %3794 = vpow2.f32 %v2890_v27  ;;  %v2889_v30 = vsub.f32 %v2878_v35, %v2887_v28 }
 0x50b   :  { %v2892_v6 = vmul.f32 1.442695, %v2889_v30 }
 0x50d   :  { %3796 = vpow2.f32 %v2892_v6 }
 0x513   :  { %v3795_v37 = vpop.eup %3794 }
 0x514   :  { %v2894_v39 = vsel %vm2881_vm4, %v3795_v37, 0.0 }
 0x515   :  { %2895 = vadd.xlane.f32.xlu1 %v2894_v39 }
 0x517   :  { %v3797_v14 = vpop.eup %3796 }
 0x518   :  { %v2897_v55 = vsel %vm2881_vm4, %v3797_v14, 0.0 }
 0x519   :  { %2898 = vadd.xlane.f32.xlu1 %v2897_v55 }
 0x5a2   :  { %v2896_v34 = vpop.xlane.xlu1 %2895 }
 0x5a3   :  { %3798 = vlog2.f32 %v2896_v34 }
 0x5a6   :  { %v2899_v22 = vpop.xlane.xlu1 %2898 }
 0x5a7   :  { %3800 = vlog2.f32 %v2899_v22 }
 0x5ad   :  { %v3799_v29 = vpop.eup %3798 }
 0x5ae   :  { %v2901_v26 = vmul.f32 0.6931472, %v3799_v29 }
 0x5b0   :  { %v2904_v51 = vsub.f32 %v2888_v38, %v2901_v26 }
 0x5b1   :  { %v3801_v36 = vpop.eup %3800 }
 0x5b2   :  { %2906 = vst.msk [vmem:[%s4965_s9] sm:$0xff] %vm2881_vm4, %v2904_v51  ;;  %v2903_v48 = vmul.f32 0.6931472, %v3801_v36 }
 0x5b4   :  { %v2905_v54 = vsub.f32 %v2889_v30, %v2903_v48 }
 0x5b6   :  { %2907 = vst.msk [vmem:[%s4965_s9 + $0x8] sm:$0xff] %vm2881_vm4, %v2905_v54 }

</bundles_post_ra>
